<compile_context>
chip_gen: v5e
topology: v5e:2x2
jax: 0.10.0
libtpu: 0.0.40
codegen_flags: <defaults>
</compile_context>

<pallas_src>
import functools

import jax
import jax.numpy as jnp
from jax.experimental import pallas as pl
from jax.experimental.pallas import tpu as pltpu


def _residual_kernel(x_ref, w3_ref, w1_ref, mask_ref, o_ref, *,
                     C_in, C_res, C_out, H, W):
    """One block of images.

    x_ref   : (Bblk, C_in, HW)   VMEM  inputs, spatial plane on the lane axis
    w3_ref  : (C_res, C_in * 9)  VMEM  3x3 conv weights, laid out (o, c*9 + tap)
    w1_ref  : (C_out, C_res)     VMEM  1x1 conv weights
    mask_ref: (9, HW)            VMEM  per-tap border-validity masks (f32 0/1)
    o_ref   : (Bblk, C_out, HW)  VMEM  outputs
    """
    HW = H * W
    Bblk = x_ref.shape[0]

    # Tiny weight/mask tiles, read once per grid step (loop-invariant).
    w3 = w3_ref[...]        # (C_res, C_in*9)
    w1 = w1_ref[...]        # (C_out, C_res)
    masks = mask_ref[...]   # (9, HW)

    # Static lane shifts for the 9 taps of a padding=1 'SAME' 3x3 conv.
    offsets = [dy * W + dx for dy in (-1, 0, 1) for dx in (-1, 0, 1)]

    @pl.loop(0, Bblk)
    def _(b):
        x = x_ref[b].astype(jnp.float32)          # (C_in, HW)
        xr = jnp.maximum(x, 0.0)                  # ReLU #1 (VPU)

        # 9 shifted + border-masked copies of ReLU(x) == the 3x3 taps.
        taps = []
        for k, s in enumerate(offsets):
            if s == 0:
                taps.append(xr)                   # center tap, always valid
            else:
                rolled = pltpu.roll(xr, shift=(-s) % HW, axis=1)   # XLU rotate
                taps.append(rolled * masks[k:k + 1, :])

        # Conv3x3 (no bias) + ReLU: broadcast FMAs on full (C_res, HW) tiles.
        acc = jnp.zeros((C_res, HW), jnp.float32)
        for c in range(C_in):
            for k in range(9):
                col = c * 9 + k
                w_col = w3[:, col:col + 1]        # (C_res, 1)
                acc = acc + w_col * taps[k][c:c + 1, :]
        h = jnp.maximum(acc, 0.0)                 # ReLU #2, (C_res, HW)

        # Conv1x1 (no bias) + residual add, computed in place on (C_out, HW).
        out = x                                   # residual path (pre-ReLU x)
        for c in range(C_res):
            out = out + w1[:, c:c + 1] * h[c:c + 1, :]

        o_ref[b] = out.astype(o_ref.dtype)


def _pick_batch_block(batch, per_image_bytes, target_bytes=256 * 1024):
    """Largest divisor of `batch` whose block stays under `target_bytes`, while
    keeping >= 2 grid steps (when batch >= 2) so both v7x TensorCores get work."""
    best = 1
    for cand in range(1, batch + 1):
        if batch % cand:
            continue
        if cand * per_image_bytes > target_bytes:
            break
        if batch >= 2 and batch // cand < 2:
            continue
        best = cand
    return best


def residual_forward(x_nchw, w3x3, w1x1):
    """x_nchw: (B, C, H, W); w3x3: (C_res, C, 3, 3); w1x1: (C, C_res[, 1, 1])."""
    B, C_in, H, W = x_nchw.shape
    C_res = w3x3.shape[0]
    w1_2d = w1x1.reshape(w1x1.shape[0], w1x1.shape[1])
    C_out = w1_2d.shape[0]
    assert w3x3.shape == (C_res, C_in, 3, 3)
    assert w1_2d.shape == (C_out, C_res)
    assert C_out == C_in, "residual add requires matching channel counts"
    HW = H * W

    # Free contiguous reshape: the spatial plane becomes the lane dimension.
    x3d = x_nchw.reshape(B, C_in, HW)
    w3_2d = w3x3.astype(jnp.float32).reshape(C_res, C_in * 9)   # (o, c*9 + tap)
    w1_2d = w1_2d.astype(jnp.float32)

    # Border-validity masks for the 9 taps (computed once, reused every step).
    pos = jnp.arange(HW, dtype=jnp.int32)
    hh, ww = pos // W, pos % W
    rows = []
    for dy in (-1, 0, 1):
        for dx in (-1, 0, 1):
            valid = ((hh + dy >= 0) & (hh + dy < H) &
                     (ww + dx >= 0) & (ww + dx < W))
            rows.append(valid.astype(jnp.float32))
    masks = jnp.stack(rows, axis=0)                              # (9, HW)

    bblk = _pick_batch_block(B, C_in * HW * x_nchw.dtype.itemsize)
    grid = (B // bblk,)

    kernel = functools.partial(
        _residual_kernel, C_in=C_in, C_res=C_res, C_out=C_out, H=H, W=W)

    out3d = pl.pallas_call(
        kernel,
        out_shape=jax.ShapeDtypeStruct((B, C_out, HW), x_nchw.dtype),
        grid_spec=pltpu.PrefetchScalarGridSpec(
            num_scalar_prefetch=0,
            grid=grid,
            in_specs=[
                pl.BlockSpec((bblk, C_in, HW), lambda b: (b, 0, 0)),
                pl.BlockSpec((C_res, C_in * 9), lambda b: (0, 0)),
                pl.BlockSpec((C_out, C_res), lambda b: (0, 0)),
                pl.BlockSpec((9, HW), lambda b: (0, 0)),
            ],
            out_specs=pl.BlockSpec((bblk, C_out, HW), lambda b: (b, 0, 0)),
        ),
        compiler_params=pltpu.CompilerParams(
            dimension_semantics=("parallel",),
        ),
    )(x3d, w3_2d, w1_2d, masks)

    return out3d.reshape(B, C_out, H, W)


if __name__ == "__main__":
    key = jax.random.PRNGKey(0)
    B, C, H, W = 2, 4, 16, 16        # in_channels = num_hiddens = 4
    C_res = 8                        # num_residual_hiddens

    kx, k1, k2 = jax.random.split(key, 3)
    x = jax.random.normal(kx, (B, C, H, W), dtype=jnp.float32)

    # Deterministic Conv2d-style init: U(-1/sqrt(fan_in), 1/sqrt(fan_in)).
    b3 = 1.0 / ((C * 9) ** 0.5)
    w3x3 = jax.random.uniform(k1, (C_res, C, 3, 3), minval=-b3, maxval=b3,
                              dtype=jnp.float32)
    b1 = 1.0 / (C_res ** 0.5)
    w1x1 = jax.random.uniform(k2, (C, C_res, 1, 1), minval=-b1, maxval=b1,
                              dtype=jnp.float32)

    out = residual_forward(x, w3x3, w1x1)
    out = jax.block_until_ready(out)

    # Reference in plain JAX (same math as the PyTorch module).
    dn = ("NCHW", "OIHW", "NCHW")
    xr = jnp.maximum(x, 0.0)
    h = jax.lax.conv_general_dilated(xr, w3x3, (1, 1), "SAME",
                                     dimension_numbers=dn,
                                     precision=jax.lax.Precision.HIGHEST)
    hr = jnp.maximum(h, 0.0)
    y = jax.lax.conv_general_dilated(hr, w1x1, (1, 1), "SAME",
                                     dimension_numbers=dn,
                                     precision=jax.lax.Precision.HIGHEST)
    ref = x + y

    assert out.shape == (B, C, H, W)
    assert jnp.allclose(out, ref, atol=1e-5, rtol=1e-5)

    print("KERNEL_OK")
</pallas_src>

<mosaic_0001>
module attributes {stable_mosaic.version = 11 : i64} {
  func.func @_residual_kernel(%arg0: i32, %arg1: memref<1x4x256xf32, #tpu.memory_space<vmem>>, %arg2: memref<8x36xf32, #tpu.memory_space<vmem>>, %arg3: memref<4x8xf32, #tpu.memory_space<vmem>>, %arg4: memref<9x256xf32, #tpu.memory_space<vmem>>, %arg5: memref<1x4x256xf32, #tpu.memory_space<vmem>>) attributes {dimension_semantics = [#tpu.dimension_semantics<parallel>], iteration_bounds = array<i64: 2>, scalar_prefetch = 0 : i64, scratch_operands = 0 : i64, tpu.core_type = #tpu.core_type<tc>, window_params = [{transform_indices = @transform_0, window_bounds = array<i64: 1, 4, 256>}, {pipeline_mode = #tpu.pipeline_mode<synchronous>, transform_indices = @transform_1, window_bounds = array<i64: 8, 36>}, {pipeline_mode = #tpu.pipeline_mode<synchronous>, transform_indices = @transform_2, window_bounds = array<i64: 4, 8>}, {pipeline_mode = #tpu.pipeline_mode<synchronous>, transform_indices = @transform_3, window_bounds = array<i64: 9, 256>}, {transform_indices = @transform_4, window_bounds = array<i64: 1, 4, 256>}]} {
    %c0 = arith.constant 0 : index
    %c0_0 = arith.constant 0 : index
    %0 = vector.load %arg2[%c0, %c0_0] : memref<8x36xf32, #tpu.memory_space<vmem>>, vector<8x36xf32>
    %c0_1 = arith.constant 0 : index
    %c0_2 = arith.constant 0 : index
    %1 = vector.load %arg3[%c0_1, %c0_2] : memref<4x8xf32, #tpu.memory_space<vmem>>, vector<4x8xf32>
    %c0_3 = arith.constant 0 : index
    %c0_4 = arith.constant 0 : index
    %2 = vector.load %arg4[%c0_3, %c0_4] : memref<9x256xf32, #tpu.memory_space<vmem>>, vector<9x256xf32>
    %c0_i32 = arith.constant 0 : i32
    %c1_i32 = arith.constant 1 : i32
    %3 = arith.muli %c0_i32, %c1_i32 : i32
    %c0_i32_5 = arith.constant 0 : i32
    %4 = arith.addi %c0_i32_5, %3 : i32
    %5 = arith.index_cast %4 : i32 to index
    %c0_6 = arith.constant 0 : index
    %c0_7 = arith.constant 0 : index
    %6 = vector.load %arg1[%5, %c0_6, %c0_7] : memref<1x4x256xf32, #tpu.memory_space<vmem>>, vector<1x4x256xf32>
    %7 = vector.shape_cast %6 : vector<1x4x256xf32> to vector<4x256xf32>
    %cst = arith.constant 0.000000e+00 : f32
    %8 = vector.broadcast %cst : f32 to vector<4x256xf32>
    %9 = arith.maximumf %7, %8 : vector<4x256xf32>
    %c17_i32 = arith.constant 17 : i32
    %10 = tpu.dynamic_rotate %9 by %c17_i32 dim 1 : vector<4x256xf32>, i32 -> vector<4x256xf32>
    %11 = vector.extract_strided_slice %2 {offsets = [0, 0], sizes = [1, 256], strides = [1, 1]} : vector<9x256xf32> to vector<1x256xf32>
    %12 = vector.broadcast %11 : vector<1x256xf32> to vector<4x256xf32>
    %13 = arith.mulf %10, %12 : vector<4x256xf32>
    %c16_i32 = arith.constant 16 : i32
    %14 = tpu.dynamic_rotate %9 by %c16_i32 dim 1 : vector<4x256xf32>, i32 -> vector<4x256xf32>
    %15 = vector.extract_strided_slice %2 {offsets = [1, 0], sizes = [1, 256], strides = [1, 1]} : vector<9x256xf32> to vector<1x256xf32>
    %16 = vector.broadcast %15 : vector<1x256xf32> to vector<4x256xf32>
    %17 = arith.mulf %14, %16 : vector<4x256xf32>
    %c15_i32 = arith.constant 15 : i32
    %18 = tpu.dynamic_rotate %9 by %c15_i32 dim 1 : vector<4x256xf32>, i32 -> vector<4x256xf32>
    %19 = vector.extract_strided_slice %2 {offsets = [2, 0], sizes = [1, 256], strides = [1, 1]} : vector<9x256xf32> to vector<1x256xf32>
    %20 = vector.broadcast %19 : vector<1x256xf32> to vector<4x256xf32>
    %21 = arith.mulf %18, %20 : vector<4x256xf32>
    %c1_i32_8 = arith.constant 1 : i32
    %22 = tpu.dynamic_rotate %9 by %c1_i32_8 dim 1 : vector<4x256xf32>, i32 -> vector<4x256xf32>
    %23 = vector.extract_strided_slice %2 {offsets = [3, 0], sizes = [1, 256], strides = [1, 1]} : vector<9x256xf32> to vector<1x256xf32>
    %24 = vector.broadcast %23 : vector<1x256xf32> to vector<4x256xf32>
    %25 = arith.mulf %22, %24 : vector<4x256xf32>
    %c255_i32 = arith.constant 255 : i32
    %26 = tpu.dynamic_rotate %9 by %c255_i32 dim 1 : vector<4x256xf32>, i32 -> vector<4x256xf32>
    %27 = vector.extract_strided_slice %2 {offsets = [5, 0], sizes = [1, 256], strides = [1, 1]} : vector<9x256xf32> to vector<1x256xf32>
    %28 = vector.broadcast %27 : vector<1x256xf32> to vector<4x256xf32>
    %29 = arith.mulf %26, %28 : vector<4x256xf32>
    %c241_i32 = arith.constant 241 : i32
    %30 = tpu.dynamic_rotate %9 by %c241_i32 dim 1 : vector<4x256xf32>, i32 -> vector<4x256xf32>
    %31 = vector.extract_strided_slice %2 {offsets = [6, 0], sizes = [1, 256], strides = [1, 1]} : vector<9x256xf32> to vector<1x256xf32>
    %32 = vector.broadcast %31 : vector<1x256xf32> to vector<4x256xf32>
    %33 = arith.mulf %30, %32 : vector<4x256xf32>
    %c240_i32 = arith.constant 240 : i32
    %34 = tpu.dynamic_rotate %9 by %c240_i32 dim 1 : vector<4x256xf32>, i32 -> vector<4x256xf32>
    %35 = vector.extract_strided_slice %2 {offsets = [7, 0], sizes = [1, 256], strides = [1, 1]} : vector<9x256xf32> to vector<1x256xf32>
    %36 = vector.broadcast %35 : vector<1x256xf32> to vector<4x256xf32>
    %37 = arith.mulf %34, %36 : vector<4x256xf32>
    %c239_i32 = arith.constant 239 : i32
    %38 = tpu.dynamic_rotate %9 by %c239_i32 dim 1 : vector<4x256xf32>, i32 -> vector<4x256xf32>
    %39 = vector.extract_strided_slice %2 {offsets = [8, 0], sizes = [1, 256], strides = [1, 1]} : vector<9x256xf32> to vector<1x256xf32>
    %40 = vector.broadcast %39 : vector<1x256xf32> to vector<4x256xf32>
    %41 = arith.mulf %38, %40 : vector<4x256xf32>
    %cst_9 = arith.constant 0.000000e+00 : f32
    %42 = vector.broadcast %cst_9 : f32 to vector<8x256xf32>
    %43 = vector.extract_strided_slice %0 {offsets = [0, 0], sizes = [8, 1], strides = [1, 1]} : vector<8x36xf32> to vector<8x1xf32>
    %44 = vector.extract_strided_slice %13 {offsets = [0, 0], sizes = [1, 256], strides = [1, 1]} : vector<4x256xf32> to vector<1x256xf32>
    %45 = vector.broadcast %43 : vector<8x1xf32> to vector<8x256xf32>
    %46 = vector.broadcast %44 : vector<1x256xf32> to vector<8x256xf32>
    %47 = arith.mulf %45, %46 : vector<8x256xf32>
    %48 = arith.addf %42, %47 : vector<8x256xf32>
    %49 = vector.extract_strided_slice %0 {offsets = [0, 1], sizes = [8, 1], strides = [1, 1]} : vector<8x36xf32> to vector<8x1xf32>
    %50 = vector.extract_strided_slice %17 {offsets = [0, 0], sizes = [1, 256], strides = [1, 1]} : vector<4x256xf32> to vector<1x256xf32>
    %51 = vector.broadcast %49 : vector<8x1xf32> to vector<8x256xf32>
    %52 = vector.broadcast %50 : vector<1x256xf32> to vector<8x256xf32>
    %53 = arith.mulf %51, %52 : vector<8x256xf32>
    %54 = arith.addf %48, %53 : vector<8x256xf32>
    %55 = vector.extract_strided_slice %0 {offsets = [0, 2], sizes = [8, 1], strides = [1, 1]} : vector<8x36xf32> to vector<8x1xf32>
    %56 = vector.extract_strided_slice %21 {offsets = [0, 0], sizes = [1, 256], strides = [1, 1]} : vector<4x256xf32> to vector<1x256xf32>
    %57 = vector.broadcast %55 : vector<8x1xf32> to vector<8x256xf32>
    %58 = vector.broadcast %56 : vector<1x256xf32> to vector<8x256xf32>
    %59 = arith.mulf %57, %58 : vector<8x256xf32>
    %60 = arith.addf %54, %59 : vector<8x256xf32>
    %61 = vector.extract_strided_slice %0 {offsets = [0, 3], sizes = [8, 1], strides = [1, 1]} : vector<8x36xf32> to vector<8x1xf32>
    %62 = vector.extract_strided_slice %25 {offsets = [0, 0], sizes = [1, 256], strides = [1, 1]} : vector<4x256xf32> to vector<1x256xf32>
    %63 = vector.broadcast %61 : vector<8x1xf32> to vector<8x256xf32>
    %64 = vector.broadcast %62 : vector<1x256xf32> to vector<8x256xf32>
    %65 = arith.mulf %63, %64 : vector<8x256xf32>
    %66 = arith.addf %60, %65 : vector<8x256xf32>
    %67 = vector.extract_strided_slice %0 {offsets = [0, 4], sizes = [8, 1], strides = [1, 1]} : vector<8x36xf32> to vector<8x1xf32>
    %68 = vector.extract_strided_slice %9 {offsets = [0, 0], sizes = [1, 256], strides = [1, 1]} : vector<4x256xf32> to vector<1x256xf32>
    %69 = vector.broadcast %67 : vector<8x1xf32> to vector<8x256xf32>
    %70 = vector.broadcast %68 : vector<1x256xf32> to vector<8x256xf32>
    %71 = arith.mulf %69, %70 : vector<8x256xf32>
    %72 = arith.addf %66, %71 : vector<8x256xf32>
    %73 = vector.extract_strided_slice %0 {offsets = [0, 5], sizes = [8, 1], strides = [1, 1]} : vector<8x36xf32> to vector<8x1xf32>
    %74 = vector.extract_strided_slice %29 {offsets = [0, 0], sizes = [1, 256], strides = [1, 1]} : vector<4x256xf32> to vector<1x256xf32>
    %75 = vector.broadcast %73 : vector<8x1xf32> to vector<8x256xf32>
    %76 = vector.broadcast %74 : vector<1x256xf32> to vector<8x256xf32>
    %77 = arith.mulf %75, %76 : vector<8x256xf32>
    %78 = arith.addf %72, %77 : vector<8x256xf32>
    %79 = vector.extract_strided_slice %0 {offsets = [0, 6], sizes = [8, 1], strides = [1, 1]} : vector<8x36xf32> to vector<8x1xf32>
    %80 = vector.extract_strided_slice %33 {offsets = [0, 0], sizes = [1, 256], strides = [1, 1]} : vector<4x256xf32> to vector<1x256xf32>
    %81 = vector.broadcast %79 : vector<8x1xf32> to vector<8x256xf32>
    %82 = vector.broadcast %80 : vector<1x256xf32> to vector<8x256xf32>
    %83 = arith.mulf %81, %82 : vector<8x256xf32>
    %84 = arith.addf %78, %83 : vector<8x256xf32>
    %85 = vector.extract_strided_slice %0 {offsets = [0, 7], sizes = [8, 1], strides = [1, 1]} : vector<8x36xf32> to vector<8x1xf32>
    %86 = vector.extract_strided_slice %37 {offsets = [0, 0], sizes = [1, 256], strides = [1, 1]} : vector<4x256xf32> to vector<1x256xf32>
    %87 = vector.broadcast %85 : vector<8x1xf32> to vector<8x256xf32>
    %88 = vector.broadcast %86 : vector<1x256xf32> to vector<8x256xf32>
    %89 = arith.mulf %87, %88 : vector<8x256xf32>
    %90 = arith.addf %84, %89 : vector<8x256xf32>
    %91 = vector.extract_strided_slice %0 {offsets = [0, 8], sizes = [8, 1], strides = [1, 1]} : vector<8x36xf32> to vector<8x1xf32>
    %92 = vector.extract_strided_slice %41 {offsets = [0, 0], sizes = [1, 256], strides = [1, 1]} : vector<4x256xf32> to vector<1x256xf32>
    %93 = vector.broadcast %91 : vector<8x1xf32> to vector<8x256xf32>
    %94 = vector.broadcast %92 : vector<1x256xf32> to vector<8x256xf32>
    %95 = arith.mulf %93, %94 : vector<8x256xf32>
    %96 = arith.addf %90, %95 : vector<8x256xf32>
    %97 = vector.extract_strided_slice %0 {offsets = [0, 9], sizes = [8, 1], strides = [1, 1]} : vector<8x36xf32> to vector<8x1xf32>
    %98 = vector.extract_strided_slice %13 {offsets = [1, 0], sizes = [1, 256], strides = [1, 1]} : vector<4x256xf32> to vector<1x256xf32>
    %99 = vector.broadcast %97 : vector<8x1xf32> to vector<8x256xf32>
    %100 = vector.broadcast %98 : vector<1x256xf32> to vector<8x256xf32>
    %101 = arith.mulf %99, %100 : vector<8x256xf32>
    %102 = arith.addf %96, %101 : vector<8x256xf32>
    %103 = vector.extract_strided_slice %0 {offsets = [0, 10], sizes = [8, 1], strides = [1, 1]} : vector<8x36xf32> to vector<8x1xf32>
    %104 = vector.extract_strided_slice %17 {offsets = [1, 0], sizes = [1, 256], strides = [1, 1]} : vector<4x256xf32> to vector<1x256xf32>
    %105 = vector.broadcast %103 : vector<8x1xf32> to vector<8x256xf32>
    %106 = vector.broadcast %104 : vector<1x256xf32> to vector<8x256xf32>
    %107 = arith.mulf %105, %106 : vector<8x256xf32>
    %108 = arith.addf %102, %107 : vector<8x256xf32>
    %109 = vector.extract_strided_slice %0 {offsets = [0, 11], sizes = [8, 1], strides = [1, 1]} : vector<8x36xf32> to vector<8x1xf32>
    %110 = vector.extract_strided_slice %21 {offsets = [1, 0], sizes = [1, 256], strides = [1, 1]} : vector<4x256xf32> to vector<1x256xf32>
    %111 = vector.broadcast %109 : vector<8x1xf32> to vector<8x256xf32>
    %112 = vector.broadcast %110 : vector<1x256xf32> to vector<8x256xf32>
    %113 = arith.mulf %111, %112 : vector<8x256xf32>
    %114 = arith.addf %108, %113 : vector<8x256xf32>
    %115 = vector.extract_strided_slice %0 {offsets = [0, 12], sizes = [8, 1], strides = [1, 1]} : vector<8x36xf32> to vector<8x1xf32>
    %116 = vector.extract_strided_slice %25 {offsets = [1, 0], sizes = [1, 256], strides = [1, 1]} : vector<4x256xf32> to vector<1x256xf32>
    %117 = vector.broadcast %115 : vector<8x1xf32> to vector<8x256xf32>
    %118 = vector.broadcast %116 : vector<1x256xf32> to vector<8x256xf32>
    %119 = arith.mulf %117, %118 : vector<8x256xf32>
    %120 = arith.addf %114, %119 : vector<8x256xf32>
    %121 = vector.extract_strided_slice %0 {offsets = [0, 13], sizes = [8, 1], strides = [1, 1]} : vector<8x36xf32> to vector<8x1xf32>
    %122 = vector.extract_strided_slice %9 {offsets = [1, 0], sizes = [1, 256], strides = [1, 1]} : vector<4x256xf32> to vector<1x256xf32>
    %123 = vector.broadcast %121 : vector<8x1xf32> to vector<8x256xf32>
    %124 = vector.broadcast %122 : vector<1x256xf32> to vector<8x256xf32>
    %125 = arith.mulf %123, %124 : vector<8x256xf32>
    %126 = arith.addf %120, %125 : vector<8x256xf32>
    %127 = vector.extract_strided_slice %0 {offsets = [0, 14], sizes = [8, 1], strides = [1, 1]} : vector<8x36xf32> to vector<8x1xf32>
    %128 = vector.extract_strided_slice %29 {offsets = [1, 0], sizes = [1, 256], strides = [1, 1]} : vector<4x256xf32> to vector<1x256xf32>
    %129 = vector.broadcast %127 : vector<8x1xf32> to vector<8x256xf32>
    %130 = vector.broadcast %128 : vector<1x256xf32> to vector<8x256xf32>
    %131 = arith.mulf %129, %130 : vector<8x256xf32>
    %132 = arith.addf %126, %131 : vector<8x256xf32>
    %133 = vector.extract_strided_slice %0 {offsets = [0, 15], sizes = [8, 1], strides = [1, 1]} : vector<8x36xf32> to vector<8x1xf32>
    %134 = vector.extract_strided_slice %33 {offsets = [1, 0], sizes = [1, 256], strides = [1, 1]} : vector<4x256xf32> to vector<1x256xf32>
    %135 = vector.broadcast %133 : vector<8x1xf32> to vector<8x256xf32>
    %136 = vector.broadcast %134 : vector<1x256xf32> to vector<8x256xf32>
    %137 = arith.mulf %135, %136 : vector<8x256xf32>
    %138 = arith.addf %132, %137 : vector<8x256xf32>
    %139 = vector.extract_strided_slice %0 {offsets = [0, 16], sizes = [8, 1], strides = [1, 1]} : vector<8x36xf32> to vector<8x1xf32>
    %140 = vector.extract_strided_slice %37 {offsets = [1, 0], sizes = [1, 256], strides = [1, 1]} : vector<4x256xf32> to vector<1x256xf32>
    %141 = vector.broadcast %139 : vector<8x1xf32> to vector<8x256xf32>
    %142 = vector.broadcast %140 : vector<1x256xf32> to vector<8x256xf32>
    %143 = arith.mulf %141, %142 : vector<8x256xf32>
    %144 = arith.addf %138, %143 : vector<8x256xf32>
    %145 = vector.extract_strided_slice %0 {offsets = [0, 17], sizes = [8, 1], strides = [1, 1]} : vector<8x36xf32> to vector<8x1xf32>
    %146 = vector.extract_strided_slice %41 {offsets = [1, 0], sizes = [1, 256], strides = [1, 1]} : vector<4x256xf32> to vector<1x256xf32>
    %147 = vector.broadcast %145 : vector<8x1xf32> to vector<8x256xf32>
    %148 = vector.broadcast %146 : vector<1x256xf32> to vector<8x256xf32>
    %149 = arith.mulf %147, %148 : vector<8x256xf32>
    %150 = arith.addf %144, %149 : vector<8x256xf32>
    %151 = vector.extract_strided_slice %0 {offsets = [0, 18], sizes = [8, 1], strides = [1, 1]} : vector<8x36xf32> to vector<8x1xf32>
    %152 = vector.extract_strided_slice %13 {offsets = [2, 0], sizes = [1, 256], strides = [1, 1]} : vector<4x256xf32> to vector<1x256xf32>
    %153 = vector.broadcast %151 : vector<8x1xf32> to vector<8x256xf32>
    %154 = vector.broadcast %152 : vector<1x256xf32> to vector<8x256xf32>
    %155 = arith.mulf %153, %154 : vector<8x256xf32>
    %156 = arith.addf %150, %155 : vector<8x256xf32>
    %157 = vector.extract_strided_slice %0 {offsets = [0, 19], sizes = [8, 1], strides = [1, 1]} : vector<8x36xf32> to vector<8x1xf32>
    %158 = vector.extract_strided_slice %17 {offsets = [2, 0], sizes = [1, 256], strides = [1, 1]} : vector<4x256xf32> to vector<1x256xf32>
    %159 = vector.broadcast %157 : vector<8x1xf32> to vector<8x256xf32>
    %160 = vector.broadcast %158 : vector<1x256xf32> to vector<8x256xf32>
    %161 = arith.mulf %159, %160 : vector<8x256xf32>
    %162 = arith.addf %156, %161 : vector<8x256xf32>
    %163 = vector.extract_strided_slice %0 {offsets = [0, 20], sizes = [8, 1], strides = [1, 1]} : vector<8x36xf32> to vector<8x1xf32>
    %164 = vector.extract_strided_slice %21 {offsets = [2, 0], sizes = [1, 256], strides = [1, 1]} : vector<4x256xf32> to vector<1x256xf32>
    %165 = vector.broadcast %163 : vector<8x1xf32> to vector<8x256xf32>
    %166 = vector.broadcast %164 : vector<1x256xf32> to vector<8x256xf32>
    %167 = arith.mulf %165, %166 : vector<8x256xf32>
    %168 = arith.addf %162, %167 : vector<8x256xf32>
    %169 = vector.extract_strided_slice %0 {offsets = [0, 21], sizes = [8, 1], strides = [1, 1]} : vector<8x36xf32> to vector<8x1xf32>
    %170 = vector.extract_strided_slice %25 {offsets = [2, 0], sizes = [1, 256], strides = [1, 1]} : vector<4x256xf32> to vector<1x256xf32>
    %171 = vector.broadcast %169 : vector<8x1xf32> to vector<8x256xf32>
    %172 = vector.broadcast %170 : vector<1x256xf32> to vector<8x256xf32>
    %173 = arith.mulf %171, %172 : vector<8x256xf32>
    %174 = arith.addf %168, %173 : vector<8x256xf32>
    %175 = vector.extract_strided_slice %0 {offsets = [0, 22], sizes = [8, 1], strides = [1, 1]} : vector<8x36xf32> to vector<8x1xf32>
    %176 = vector.extract_strided_slice %9 {offsets = [2, 0], sizes = [1, 256], strides = [1, 1]} : vector<4x256xf32> to vector<1x256xf32>
    %177 = vector.broadcast %175 : vector<8x1xf32> to vector<8x256xf32>
    %178 = vector.broadcast %176 : vector<1x256xf32> to vector<8x256xf32>
    %179 = arith.mulf %177, %178 : vector<8x256xf32>
    %180 = arith.addf %174, %179 : vector<8x256xf32>
    %181 = vector.extract_strided_slice %0 {offsets = [0, 23], sizes = [8, 1], strides = [1, 1]} : vector<8x36xf32> to vector<8x1xf32>
    %182 = vector.extract_strided_slice %29 {offsets = [2, 0], sizes = [1, 256], strides = [1, 1]} : vector<4x256xf32> to vector<1x256xf32>
    %183 = vector.broadcast %181 : vector<8x1xf32> to vector<8x256xf32>
    %184 = vector.broadcast %182 : vector<1x256xf32> to vector<8x256xf32>
    %185 = arith.mulf %183, %184 : vector<8x256xf32>
    %186 = arith.addf %180, %185 : vector<8x256xf32>
    %187 = vector.extract_strided_slice %0 {offsets = [0, 24], sizes = [8, 1], strides = [1, 1]} : vector<8x36xf32> to vector<8x1xf32>
    %188 = vector.extract_strided_slice %33 {offsets = [2, 0], sizes = [1, 256], strides = [1, 1]} : vector<4x256xf32> to vector<1x256xf32>
    %189 = vector.broadcast %187 : vector<8x1xf32> to vector<8x256xf32>
    %190 = vector.broadcast %188 : vector<1x256xf32> to vector<8x256xf32>
    %191 = arith.mulf %189, %190 : vector<8x256xf32>
    %192 = arith.addf %186, %191 : vector<8x256xf32>
    %193 = vector.extract_strided_slice %0 {offsets = [0, 25], sizes = [8, 1], strides = [1, 1]} : vector<8x36xf32> to vector<8x1xf32>
    %194 = vector.extract_strided_slice %37 {offsets = [2, 0], sizes = [1, 256], strides = [1, 1]} : vector<4x256xf32> to vector<1x256xf32>
    %195 = vector.broadcast %193 : vector<8x1xf32> to vector<8x256xf32>
    %196 = vector.broadcast %194 : vector<1x256xf32> to vector<8x256xf32>
    %197 = arith.mulf %195, %196 : vector<8x256xf32>
    %198 = arith.addf %192, %197 : vector<8x256xf32>
    %199 = vector.extract_strided_slice %0 {offsets = [0, 26], sizes = [8, 1], strides = [1, 1]} : vector<8x36xf32> to vector<8x1xf32>
    %200 = vector.extract_strided_slice %41 {offsets = [2, 0], sizes = [1, 256], strides = [1, 1]} : vector<4x256xf32> to vector<1x256xf32>
    %201 = vector.broadcast %199 : vector<8x1xf32> to vector<8x256xf32>
    %202 = vector.broadcast %200 : vector<1x256xf32> to vector<8x256xf32>
    %203 = arith.mulf %201, %202 : vector<8x256xf32>
    %204 = arith.addf %198, %203 : vector<8x256xf32>
    %205 = vector.extract_strided_slice %0 {offsets = [0, 27], sizes = [8, 1], strides = [1, 1]} : vector<8x36xf32> to vector<8x1xf32>
    %206 = vector.extract_strided_slice %13 {offsets = [3, 0], sizes = [1, 256], strides = [1, 1]} : vector<4x256xf32> to vector<1x256xf32>
    %207 = vector.broadcast %205 : vector<8x1xf32> to vector<8x256xf32>
    %208 = vector.broadcast %206 : vector<1x256xf32> to vector<8x256xf32>
    %209 = arith.mulf %207, %208 : vector<8x256xf32>
    %210 = arith.addf %204, %209 : vector<8x256xf32>
    %211 = vector.extract_strided_slice %0 {offsets = [0, 28], sizes = [8, 1], strides = [1, 1]} : vector<8x36xf32> to vector<8x1xf32>
    %212 = vector.extract_strided_slice %17 {offsets = [3, 0], sizes = [1, 256], strides = [1, 1]} : vector<4x256xf32> to vector<1x256xf32>
    %213 = vector.broadcast %211 : vector<8x1xf32> to vector<8x256xf32>
    %214 = vector.broadcast %212 : vector<1x256xf32> to vector<8x256xf32>
    %215 = arith.mulf %213, %214 : vector<8x256xf32>
    %216 = arith.addf %210, %215 : vector<8x256xf32>
    %217 = vector.extract_strided_slice %0 {offsets = [0, 29], sizes = [8, 1], strides = [1, 1]} : vector<8x36xf32> to vector<8x1xf32>
    %218 = vector.extract_strided_slice %21 {offsets = [3, 0], sizes = [1, 256], strides = [1, 1]} : vector<4x256xf32> to vector<1x256xf32>
    %219 = vector.broadcast %217 : vector<8x1xf32> to vector<8x256xf32>
    %220 = vector.broadcast %218 : vector<1x256xf32> to vector<8x256xf32>
    %221 = arith.mulf %219, %220 : vector<8x256xf32>
    %222 = arith.addf %216, %221 : vector<8x256xf32>
    %223 = vector.extract_strided_slice %0 {offsets = [0, 30], sizes = [8, 1], strides = [1, 1]} : vector<8x36xf32> to vector<8x1xf32>
    %224 = vector.extract_strided_slice %25 {offsets = [3, 0], sizes = [1, 256], strides = [1, 1]} : vector<4x256xf32> to vector<1x256xf32>
    %225 = vector.broadcast %223 : vector<8x1xf32> to vector<8x256xf32>
    %226 = vector.broadcast %224 : vector<1x256xf32> to vector<8x256xf32>
    %227 = arith.mulf %225, %226 : vector<8x256xf32>
    %228 = arith.addf %222, %227 : vector<8x256xf32>
    %229 = vector.extract_strided_slice %0 {offsets = [0, 31], sizes = [8, 1], strides = [1, 1]} : vector<8x36xf32> to vector<8x1xf32>
    %230 = vector.extract_strided_slice %9 {offsets = [3, 0], sizes = [1, 256], strides = [1, 1]} : vector<4x256xf32> to vector<1x256xf32>
    %231 = vector.broadcast %229 : vector<8x1xf32> to vector<8x256xf32>
    %232 = vector.broadcast %230 : vector<1x256xf32> to vector<8x256xf32>
    %233 = arith.mulf %231, %232 : vector<8x256xf32>
    %234 = arith.addf %228, %233 : vector<8x256xf32>
    %235 = vector.extract_strided_slice %0 {offsets = [0, 32], sizes = [8, 1], strides = [1, 1]} : vector<8x36xf32> to vector<8x1xf32>
    %236 = vector.extract_strided_slice %29 {offsets = [3, 0], sizes = [1, 256], strides = [1, 1]} : vector<4x256xf32> to vector<1x256xf32>
    %237 = vector.broadcast %235 : vector<8x1xf32> to vector<8x256xf32>
    %238 = vector.broadcast %236 : vector<1x256xf32> to vector<8x256xf32>
    %239 = arith.mulf %237, %238 : vector<8x256xf32>
    %240 = arith.addf %234, %239 : vector<8x256xf32>
    %241 = vector.extract_strided_slice %0 {offsets = [0, 33], sizes = [8, 1], strides = [1, 1]} : vector<8x36xf32> to vector<8x1xf32>
    %242 = vector.extract_strided_slice %33 {offsets = [3, 0], sizes = [1, 256], strides = [1, 1]} : vector<4x256xf32> to vector<1x256xf32>
    %243 = vector.broadcast %241 : vector<8x1xf32> to vector<8x256xf32>
    %244 = vector.broadcast %242 : vector<1x256xf32> to vector<8x256xf32>
    %245 = arith.mulf %243, %244 : vector<8x256xf32>
    %246 = arith.addf %240, %245 : vector<8x256xf32>
    %247 = vector.extract_strided_slice %0 {offsets = [0, 34], sizes = [8, 1], strides = [1, 1]} : vector<8x36xf32> to vector<8x1xf32>
    %248 = vector.extract_strided_slice %37 {offsets = [3, 0], sizes = [1, 256], strides = [1, 1]} : vector<4x256xf32> to vector<1x256xf32>
    %249 = vector.broadcast %247 : vector<8x1xf32> to vector<8x256xf32>
    %250 = vector.broadcast %248 : vector<1x256xf32> to vector<8x256xf32>
    %251 = arith.mulf %249, %250 : vector<8x256xf32>
    %252 = arith.addf %246, %251 : vector<8x256xf32>
    %253 = vector.extract_strided_slice %0 {offsets = [0, 35], sizes = [8, 1], strides = [1, 1]} : vector<8x36xf32> to vector<8x1xf32>
    %254 = vector.extract_strided_slice %41 {offsets = [3, 0], sizes = [1, 256], strides = [1, 1]} : vector<4x256xf32> to vector<1x256xf32>
    %255 = vector.broadcast %253 : vector<8x1xf32> to vector<8x256xf32>
    %256 = vector.broadcast %254 : vector<1x256xf32> to vector<8x256xf32>
    %257 = arith.mulf %255, %256 : vector<8x256xf32>
    %258 = arith.addf %252, %257 : vector<8x256xf32>
    %cst_10 = arith.constant 0.000000e+00 : f32
    %259 = vector.broadcast %cst_10 : f32 to vector<8x256xf32>
    %260 = arith.maximumf %258, %259 : vector<8x256xf32>
    %261 = vector.extract_strided_slice %1 {offsets = [0, 0], sizes = [4, 1], strides = [1, 1]} : vector<4x8xf32> to vector<4x1xf32>
    %262 = vector.extract_strided_slice %260 {offsets = [0, 0], sizes = [1, 256], strides = [1, 1]} : vector<8x256xf32> to vector<1x256xf32>
    %263 = vector.broadcast %261 : vector<4x1xf32> to vector<4x256xf32>
    %264 = vector.broadcast %262 : vector<1x256xf32> to vector<4x256xf32>
    %265 = arith.mulf %263, %264 : vector<4x256xf32>
    %266 = arith.addf %7, %265 : vector<4x256xf32>
    %267 = vector.extract_strided_slice %1 {offsets = [0, 1], sizes = [4, 1], strides = [1, 1]} : vector<4x8xf32> to vector<4x1xf32>
    %268 = vector.extract_strided_slice %260 {offsets = [1, 0], sizes = [1, 256], strides = [1, 1]} : vector<8x256xf32> to vector<1x256xf32>
    %269 = vector.broadcast %267 : vector<4x1xf32> to vector<4x256xf32>
    %270 = vector.broadcast %268 : vector<1x256xf32> to vector<4x256xf32>
    %271 = arith.mulf %269, %270 : vector<4x256xf32>
    %272 = arith.addf %266, %271 : vector<4x256xf32>
    %273 = vector.extract_strided_slice %1 {offsets = [0, 2], sizes = [4, 1], strides = [1, 1]} : vector<4x8xf32> to vector<4x1xf32>
    %274 = vector.extract_strided_slice %260 {offsets = [2, 0], sizes = [1, 256], strides = [1, 1]} : vector<8x256xf32> to vector<1x256xf32>
    %275 = vector.broadcast %273 : vector<4x1xf32> to vector<4x256xf32>
    %276 = vector.broadcast %274 : vector<1x256xf32> to vector<4x256xf32>
    %277 = arith.mulf %275, %276 : vector<4x256xf32>
    %278 = arith.addf %272, %277 : vector<4x256xf32>
    %279 = vector.extract_strided_slice %1 {offsets = [0, 3], sizes = [4, 1], strides = [1, 1]} : vector<4x8xf32> to vector<4x1xf32>
    %280 = vector.extract_strided_slice %260 {offsets = [3, 0], sizes = [1, 256], strides = [1, 1]} : vector<8x256xf32> to vector<1x256xf32>
    %281 = vector.broadcast %279 : vector<4x1xf32> to vector<4x256xf32>
    %282 = vector.broadcast %280 : vector<1x256xf32> to vector<4x256xf32>
    %283 = arith.mulf %281, %282 : vector<4x256xf32>
    %284 = arith.addf %278, %283 : vector<4x256xf32>
    %285 = vector.extract_strided_slice %1 {offsets = [0, 4], sizes = [4, 1], strides = [1, 1]} : vector<4x8xf32> to vector<4x1xf32>
    %286 = vector.extract_strided_slice %260 {offsets = [4, 0], sizes = [1, 256], strides = [1, 1]} : vector<8x256xf32> to vector<1x256xf32>
    %287 = vector.broadcast %285 : vector<4x1xf32> to vector<4x256xf32>
    %288 = vector.broadcast %286 : vector<1x256xf32> to vector<4x256xf32>
    %289 = arith.mulf %287, %288 : vector<4x256xf32>
    %290 = arith.addf %284, %289 : vector<4x256xf32>
    %291 = vector.extract_strided_slice %1 {offsets = [0, 5], sizes = [4, 1], strides = [1, 1]} : vector<4x8xf32> to vector<4x1xf32>
    %292 = vector.extract_strided_slice %260 {offsets = [5, 0], sizes = [1, 256], strides = [1, 1]} : vector<8x256xf32> to vector<1x256xf32>
    %293 = vector.broadcast %291 : vector<4x1xf32> to vector<4x256xf32>
    %294 = vector.broadcast %292 : vector<1x256xf32> to vector<4x256xf32>
    %295 = arith.mulf %293, %294 : vector<4x256xf32>
    %296 = arith.addf %290, %295 : vector<4x256xf32>
    %297 = vector.extract_strided_slice %1 {offsets = [0, 6], sizes = [4, 1], strides = [1, 1]} : vector<4x8xf32> to vector<4x1xf32>
    %298 = vector.extract_strided_slice %260 {offsets = [6, 0], sizes = [1, 256], strides = [1, 1]} : vector<8x256xf32> to vector<1x256xf32>
    %299 = vector.broadcast %297 : vector<4x1xf32> to vector<4x256xf32>
    %300 = vector.broadcast %298 : vector<1x256xf32> to vector<4x256xf32>
    %301 = arith.mulf %299, %300 : vector<4x256xf32>
    %302 = arith.addf %296, %301 : vector<4x256xf32>
    %303 = vector.extract_strided_slice %1 {offsets = [0, 7], sizes = [4, 1], strides = [1, 1]} : vector<4x8xf32> to vector<4x1xf32>
    %304 = vector.extract_strided_slice %260 {offsets = [7, 0], sizes = [1, 256], strides = [1, 1]} : vector<8x256xf32> to vector<1x256xf32>
    %305 = vector.broadcast %303 : vector<4x1xf32> to vector<4x256xf32>
    %306 = vector.broadcast %304 : vector<1x256xf32> to vector<4x256xf32>
    %307 = arith.mulf %305, %306 : vector<4x256xf32>
    %308 = arith.addf %302, %307 : vector<4x256xf32>
    %309 = arith.index_cast %4 : i32 to index
    %c0_11 = arith.constant 0 : index
    %c0_12 = arith.constant 0 : index
    %310 = vector.load %arg5[%309, %c0_11, %c0_12] : memref<1x4x256xf32, #tpu.memory_space<vmem>>, vector<1x4x256xf32>
    %311 = vector.shape_cast %310 : vector<1x4x256xf32> to vector<4x256xf32>
    %312 = vector.shape_cast %308 : vector<4x256xf32> to vector<1x4x256xf32>
    tpu.vector_store %arg5[%309, %c0_11, %c0_12], %312 {strides = array<i32>} : memref<1x4x256xf32, #tpu.memory_space<vmem>>, vector<1x4x256xf32>,
    %c1_i32_13 = arith.constant 1 : i32
    return
  }
  func.func @transform_0(%arg0: i32) -> (i32, i32, i32) {
    %c0_i32 = arith.constant 0 : i32
    %c0_i32_0 = arith.constant 0 : i32
    %c0_i32_1 = arith.constant 0 : i32
    return %arg0, %c0_i32, %c0_i32_0 : i32, i32, i32
  }
  func.func @transform_1(%arg0: i32) -> (i32, i32) {
    %c0_i32 = arith.constant 0 : i32
    %c0_i32_0 = arith.constant 0 : i32
    %c0_i32_1 = arith.constant 0 : i32
    return %c0_i32, %c0_i32_0 : i32, i32
  }
  func.func @transform_2(%arg0: i32) -> (i32, i32) {
    %c0_i32 = arith.constant 0 : i32
    %c0_i32_0 = arith.constant 0 : i32
    %c0_i32_1 = arith.constant 0 : i32
    return %c0_i32, %c0_i32_0 : i32, i32
  }
  func.func @transform_3(%arg0: i32) -> (i32, i32) {
    %c0_i32 = arith.constant 0 : i32
    %c0_i32_0 = arith.constant 0 : i32
    %c0_i32_1 = arith.constant 0 : i32
    return %c0_i32, %c0_i32_0 : i32, i32
  }
  func.func @transform_4(%arg0: i32) -> (i32, i32, i32) {
    %c0_i32 = arith.constant 0 : i32
    %c0_i32_0 = arith.constant 0 : i32
    %c0_i32_1 = arith.constant 0 : i32
    return %arg0, %c0_i32, %c0_i32_0 : i32, i32, i32
  }
}

</mosaic_0001>

<bundles_post_ra>
// kernel: tpu_custom_call.1
= control target key start
LH: loop header
LB: loop body
LE: loop exit
PB: predicated region body
PF: predicated region fallthrough
CT: control target
= control target key end

     0   :  { %9 = vsyncpa [#allocation3], 0  ;;  %s1933_s0 = inlined_call_operand.hbm [shape: f32[2,4,256], index: 0, kind: input, shape index: {}]   ;;  %s1934_s1 = inlined_call_operand.hbm [shape: f32[8,36], index: 1, kind: input, shape index: {}]   ;;  %s1935_s2 = inlined_call_operand.hbm [shape: f32[4,8], index: 2, kind: input, shape index: {}]   ;;  %s1936_s3 = inlined_call_operand.hbm [shape: f32[9,256], index: 3, kind: input, shape index: {}]   ;;  %s1937_s4 = inlined_call_operand.hbm [shape: f32[2,4,256], index: 4, kind: output, shape index: {}]  }
   0x1   :  { %11 = vsyncpa [#allocation3 + $0x1], 0 }
   0x2   :  { %12 = vsyncpa [#allocation6], 0 }
   0x3   :  { %13 = vsyncpa [#allocation9], 0 }
   0x4   :  { %14 = vsyncpa [#allocation4], 0 }
   0x5   :  { %16 = vsyncpa [#allocation4 + $0x1], 0  ;;  %s1474_s15 = smov 0   ;;  %s1476_s16 = smov 0  }
   0x6   :  { %s1478_s17 = smov 0   ;;  %s1480_s18 = smov 0  }
   0x7 LB: > { %s1495_s19 = sadd.s32 4294967295, %s1398_s18   ;;  %s1011_s20 = sadd.s32 4294967294, %s1398_s18   ;;  %s1398_s18 = sphi %s1480_s18, %s1948_s18   ;;  %s1394_s17 = sphi %s1478_s17, %s1947_s17   ;;  %s1390_s16 = sphi %s1476_s16, %s1946_s16   ;;  %s1386_s15 = sphi %s1474_s15, %s1945_s15  }
   0x8   : > { %p42_p0 = scmp.ne.s32.totalorder %s1390_s16, %s1386_s15  ;;  %p43_p1 = scmp.eq.s32.totalorder %s1495_s19, 0 }
   0x9   : > { %p129_p2 = scmp.eq.s32.totalorder %s1495_s19, 1  ;;  %p135_p3 = scmp.eq.s32.totalorder %s1011_s20, 1 }
   0xa   : > { %p1504_p4 = por %p43_p1, %p42_p0  ;;  %p1012_p5 = scmp.ge.s32.totalorder %s1398_s18, 1 }
   0xb   : > { %p1509_p6 = por %p135_p3, %p42_p0  ;;  %p142_p7 = scmp.lt.s32.totalorder %s1398_s18, 3 }
   0xc   : > { %s154_s25 = sshll.u32 %s1934_s1, 4  ;;  %s1400_s27 = smov [#allocation5]   ;;  %s155_s25 = int_to_ptr.hbm [resolvable:$true] %s154_s25 }
   0xd   : > { %p1517_p8 = pnand %p1012_p5, %p142_p7  ;;  %s156_s28 = sshll.u32 %s1400_s27, 4  ;;  %s157_s28 = int_to_ptr.vmem [resolvable:$true] %s156_s28 }
   0xe   : > { %s166_s5 = sshll.u32 %s1935_s2, 4  ;;  %s177_s9 = sshll.u32 %s1936_s3, 4  ;;  %s167_s5 = int_to_ptr.hbm [resolvable:$true] %s166_s5  ;;  %s178_s9 = int_to_ptr.hbm [resolvable:$true] %s177_s9 }
   0xf   : > { %p1049_p10 = pneg %p1517_p8  ;;  %s1401_s10 = smov [#allocation7]  }
  0x10   : > { %s168_s11 = sshll.u32 %s1401_s10, 4  ;;  %s1402_s12 = smov [#allocation8]   ;;  %s169_s11 = int_to_ptr.vmem [resolvable:$true] %s168_s11 }
  0x11   : > { %p1529_p11 = pnand %p1049_p10, %p43_p1  ;;  %s179_s13 = sshll.u32 %s1402_s12, 4  ;;  %s180_s13 = int_to_ptr.vmem [resolvable:$true] %s179_s13 }
  0x12   : > { %s1403_s14 = smov 256   ;;  %s1404_s20 = smov 16  }
  0x13   : > { %1052 = dma.hbm_to_vmem [thread:$0]  (!%p1529_p11), %s155_s25, 128, %s157_s28, [#allocation6]  }
  0x14   : > { %1055 = dma.hbm_to_vmem [thread:$0]  (!%p1529_p11), %s167_s5, 64, %s169_s11, [#allocation6]  }
  0x15   : > { %1058 = dma.hbm_to_vmem [thread:$0]  (!%p1529_p11), %s178_s9, 512, %s180_s13, [#allocation9], %s1403_s14, %s1403_s14, %s1404_s20  }
  0x16   : > { %s1543_s23 = sadd.s32 1, %s1398_s18   ;;  %s29_s25 = sadd.s32 1, %s1394_s17 }
  0x17   : > { %s26_s24 = ssub.s32 %s1398_s18, %s1543_s23  ;;  %p36_p13 = scmp.ne.s32.totalorder %s1394_s17, %s1390_s16 }
  0x18   : > { %p27_p12 = scmp.eq.s32.totalorder %s26_s24, 0  ;;  %p37_p0 = scmp.eq.s32.totalorder %s1398_s18, 0 }
  0x19   : > { %p1556_p3 = por %p129_p2, %p36_p13  ;;  %p1070_p5 = scmp.lt.s32.totalorder %s1398_s18, 2 }
  0x1a   : > { %s1552_s27 = scalar_select %p27_p12, %s1394_s17, %s29_s25  }
  0x1b   : > { %s193_s29 = sand.u32 1, %s1394_s17   ;;  %s1031_s30 = sshll.u32 %s1398_s18, 3 }
  0x1c   : > { %p38_p7 = por %p37_p0, %p36_p13  ;;  %s1017_s5 = sshll.u32 %s193_s29, 3 }
  0x1d   : > { %s202_s8 = scalar_lea.hbm %s1933_s0, %s1031_s30  ;;  %s197_s10 = scalar_lea.vmem [#allocation2], %s1017_s5 }
  0x1e   : > { %s204_s9 = sshll.u32 %s202_s8, 4  ;;  %s206_s11 = sshll.u32 %s197_s10, 4  ;;  %s205_s9 = int_to_ptr.hbm [resolvable:$true] %s204_s9  ;;  %s207_s11 = int_to_ptr.vmem [resolvable:$true] %s206_s11 }
  0x1f   : > { %p1566_p10 = pnand %p1070_p5, %p38_p7  ;;  %s194_s13 = scalar_lea.sflag [#allocation3], %s193_s29 }
  0x20   : > { %s1294_s14 = sshra.s32 %s205_s9, 4  ;;  %s1301_s30 = scalar_lea.hbm %s1933_s0, 16  ;;  %s1295_s14 = int_to_ptr.hbm [resolvable:$true] %s1294_s14 }
  0x21   : > { %s1296_s20 = scalar_lea.hbm %s1295_s14, 8  ;;  %p1298_p11 = pneg %p1566_p10 }
  0x22   : > { %p1297_p2 = scmp.ne.s32.totalorder %s1295_s14, %s1296_s20  ;;  %p1302_p0 = scmp.lt.s32.totalorder %s1295_s14, %s1933_s0 }
  0x23   : > { %p1303_p5 = scmp.lt.s32.totalorder %s1301_s30, %s1296_s20 }
  0x24   : > { %p1299_p12 = pnand %p1298_p11, %p1297_p2 }
  0x25   : > { %p1304_p7 = por %p1303_p5, %p1302_p0 }
  0x26   : > { %p1300_p13 = pneg %p1299_p12 }
  0x28   : > { %p1305_p9 = pnand %p1304_p7, %p1300_p13 }
  0x2a   : > { %1308 = shalt.err (!%p1305_p9)
}
  0x2b   : > { %1062 = dma.hbm_to_vmem [thread:$0]  (!%p1566_p10), %s205_s9, 128, %s207_s11, %s194_s13  }
  0x2c   : > { %215 = sbr.rel (%p1517_p8) target bundleno = 374 (0x176), region = 36  ;;  %s1583_s29 = sand.u32 (!%p1517_p8), 1, %s1390_s16  }
  0x2d   : > { %s1021_s7 = sshll.u32 (!%p1517_p8), %s1583_s29, 3  ;;  %s218_s8 = scalar_lea.sflag (!%p1517_p8), [#allocation3], %s1583_s29 }
  0x2e   : > { %s1589_s10 = scalar_lea.vmem (!%p1517_p8), [#allocation2], %s1021_s7 }
  0x31   : > { %1369 = dma.done.wait (%p1504_p4), %s218_s8, 128  }
  0x32   : > { %1371 = vsyncadd (%p1504_p4), %s218_s8, 4294967168 }
  0x33   : > { %1373 = dma.done.wait (%p43_p1), [#allocation6], 192  }
  0x34   : > { %1375 = vsyncadd (%p43_p1), [#allocation6], 4294967104 }
  0x35   : > { %1377 = dma.done.wait (%p43_p1), [#allocation9], 512  }
  0x36   : > { %1379 = vsyncadd (%p43_p1), [#allocation9], 4294966784  ;;  %v1405_v0 = vmov 1   ;;  %v1406_v1 = vmov 0   ;;  %v1407_v2 = vmov 2   ;;  %v1606_v3 = vld [vmem:[#allocation5] sm:$0xff]  ;;  %v280_v54 = vlaneseq }
  0x37   : > { %1157 = vset.pattern.permute.xlu2 %v1405_v0  ;;  %1156 = vset.pattern.permute.xlu1 %v1406_v1  ;;  %v268_v4 = vld [vmem:[%s1589_s10] sm:$0xff]  ;;  %v1408_v6 = vmov 4   ;;  %v1409_v7 = vmov 3   ;;  %s1410_s21 = smov 17   ;;  %v1411_v10 = vmov 6   ;;  %v1412_v13 = vmov 5  }
  0x38   : > { %1158 = vset.pattern.permute.xlu0 %v1407_v2  ;;  %413 = vperm.xlu2 %1157, %v1606_v3   ;;  %v1611_v5 = vmax.f32 %v268_v4, 0.0  ;;  %s1413_s26 = smov 16   ;;  %s1414_s9 = smov 15   ;;  %v1415_v16 = vmov 9   ;;  %v1417_v19 = vmov 7   ;;  %v1419_v22 = vmov 8  }
  0x39   : > { %403 = vperm.xlu1 %1156, %v1606_v3   ;;  %s1416_s11 = smov 1   ;;  %s1418_s12 = smov 127   ;;  %v1422_v27 = vmov 11   ;;  %v1423_v28 = vmov 12   ;;  %v1424_v29 = vmov 10   ;;  %v1426_v32 = vmov 14  }
  0x3a   : > { %271 = vst [vmem:[#allocation1] ss:$2 sm:$0xff] %v1611_v5  ;;  %s1420_s13 = smov 112   ;;  %s1421_s14 = smov 113   ;;  %v1427_v33 = vmov 17   ;;  %v1428_v34 = vmov 13  }
  0x3b   : > { %s1425_s20 = smov 111   ;;  %v1429_v35 = vmov 16   ;;  %v1430_v37 = vmov 22   ;;  %v1431_v38 = vmov 15   ;;  %v1432_v39 = vmov 19   ;;  %v1670_v59 = vld [vmem:[#allocation8] sm:$0xff] }
  0x3c   : > { %v1433_v41 = vmov 27   ;;  %v1434_v42 = vmov 18   ;;  %v1435_v43 = vmov 21   ;;  %v1436_v45 = vmov 32   ;;  %v1668_v58 = vld [vmem:[#allocation7] sm:$0xf] }
  0x3d   : > { %v1437_v46 = vmov 20   ;;  %v1438_v49 = vmov 24   ;;  %v1439_v50 = vmov 23   ;;  %v1440_v55 = vmov 26   ;;  %v1672_v60 = vld [vmem:[#allocation8 + $0x8] sm:$0xff]  ;;  %s1032_s24 = sshll.u32 %s1495_s19, 3 }
  0x3e   : > { %v1441_v56 = vmov 25   ;;  %v1665_v57 = vand.u32 127, %v280_v54  ;;  %v286_v4 = vperm.slane %v1672_v60, 0  ;;  %v333_v54 = vperm.slane %v1670_v59, 3  ;;  %s907_s5 = scalar_lea.hbm %s1937_s4, %s1032_s24  ;;  %s261_s6 = scalar_lea.vmem [#allocation10], %s1021_s7 }
  0x3f   : > { %vm792_vm8 = vcmask 1043456   ;;  %s909_s8 = sshll.u32 %s261_s6, 4  ;;  %s896_s19 = scalar_lea.sflag [#allocation4], %s1583_s29  ;;  %s910_s8 = int_to_ptr.vmem [resolvable:$true] %s909_s8 }
  0x40   : > { %1160 = vset.pattern.permute.xlu2 %v1408_v6  ;;  %vm282_vm0 = vcmp.lt.s32.totalorder %v1665_v57, 17  ;;  %vm298_vm1 = vcmp.lt.s32.totalorder %v1665_v57, 16  ;;  %vm314_vm2 = vcmp.lt.s32.totalorder %v1665_v57, 15  ;;  %vm346_vm3 = vcmp.lt.s32.totalorder %v1665_v57, 127  ;;  %s1344_s7 = scalar_lea.hbm %s1937_s4, 16 }
  0x41   : > { %1159 = vset.pattern.permute.xlu1 %v1409_v7  ;;  %443 = vperm.xlu2 %1160, %v1606_v3   ;;  %v272_v8 = vld.sshfl [vmem:[#allocation1] sm:$0xff pattern:$0x75316420]  ;;  %v273_v9 = vld.sshfl [vmem:[#allocation1 + $0x8] sm:$0xff pattern:$0x75316420] }
  0x42   : > { %433 = vperm.xlu1 %1159, %v1606_v3   ;;  %276 = vrot.lane.b32.xlu0 %v272_v8, %s1410_s21  ;;  %289 = vst [vmem:[#allocation1] ss:$2 sm:$0xff] %v1611_v5  ;;  %v1442_v8 = vmov 29   ;;  %vm330_vm4 = vcmp.lt.s32.totalorder %v1665_v57, 1  ;;  %vm362_vm5 = vcmp.lt.s32.totalorder %v1665_v57, 113  ;;  %vm394_vm6 = vcmp.lt.s32.totalorder %v1665_v57, 111 }
  0x43   : > { %vm378_vm7 = vcmp.lt.s32.totalorder %v1665_v57, 112 }
  0x49   : > { %1162 = vset.pattern.permute.xlu2 %v1411_v10  ;;  %v290_v11 = vld.sshfl [vmem:[#allocation1] sm:$0xff pattern:$0x75316420]  ;;  %v291_v12 = vld.sshfl [vmem:[#allocation1 + $0x8] sm:$0xff pattern:$0x75316420] }
  0x4a   : > { %1161 = vset.pattern.permute.xlu1 %v1412_v13  ;;  %278 = vrot.lane.b32.xlu0 %v273_v9, %s1410_s21  ;;  %305 = vst [vmem:[#allocation1] ss:$2 sm:$0xff] %v1611_v5 }
  0x4b   : > { %467 = vperm.xlu2 %1162, %v1606_v3   ;;  %294 = vrot.lane.b32.xlu1 %v290_v11, %s1413_s26 }
  0x51   : > { %v306_v14 = vld.sshfl [vmem:[#allocation1] sm:$0xff pattern:$0x75316420]  ;;  %v307_v15 = vld.sshfl [vmem:[#allocation1 + $0x8] sm:$0xff pattern:$0x75316420] }
  0x52   : > { %423 = vperm.xlu0 %1158, %v1606_v3   ;;  %321 = vst [vmem:[#allocation1] ss:$2 sm:$0xff] %v1611_v5 }
  0x53   : > { %310 = vrot.lane.b32.xlu2 %v306_v14, %s1414_s9  ;;  %296 = vrot.lane.b32.xlu1 %v291_v12, %s1413_s26  ;;  %v1443_v12 = vmov 28  }
  0x54   : > { %1165 = vset.pattern.permute.xlu2 %v1415_v16  ;;  %v301_v16 = vperm.slane %v1670_v59, 1 }
  0x59   : > { %v323_v17 = vld.sshfl [vmem:[#allocation1 + $0x8] sm:$0xff pattern:$0x75316420]  ;;  %v322_v18 = vld.sshfl [vmem:[#allocation1] sm:$0xff pattern:$0x75316420] }
  0x5a   : > { %326 = vrot.lane.b32.xlu0 %v322_v18, %s1416_s11  ;;  %337 = vst [vmem:[#allocation1] ss:$2 sm:$0xff] %v1611_v5 }
  0x5b   : > { %312 = vrot.lane.b32.xlu2 %v307_v15, %s1414_s9  ;;  %457 = vperm.xlu1 %1161, %v1606_v3  }
  0x5c   : > { %1163 = vset.pattern.permute.xlu0 %v1417_v19 }
  0x61   : > { %v339_v20 = vld.sshfl [vmem:[#allocation1 + $0x8] sm:$0xff pattern:$0x75316420]  ;;  %v338_v21 = vld.sshfl [vmem:[#allocation1] sm:$0xff pattern:$0x75316420] }
  0x62   : > { %344 = vrot.lane.b32.xlu0 %v339_v20, %s1418_s12  ;;  %353 = vst [vmem:[#allocation1] ss:$2 sm:$0xff] %v1611_v5 }
  0x63   : > { %342 = vrot.lane.b32.xlu2 %v338_v21, %s1418_s12  ;;  %328 = vrot.lane.b32.xlu1 %v323_v17, %s1416_s11  ;;  %v302_v17 = vperm.slane %v1672_v60, 1 }
  0x64   : > { %1164 = vset.pattern.permute.xlu1 %v1419_v22 }
  0x69   : > { %v354_v23 = vld.sshfl [vmem:[#allocation1] sm:$0xff pattern:$0x75316420]  ;;  %v355_v24 = vld.sshfl [vmem:[#allocation1 + $0x8] sm:$0xff pattern:$0x75316420] }
  0x6a   : > { %369 = vst [vmem:[#allocation1] ss:$2 sm:$0xff] %v1611_v5  ;;  %477 = vperm.xlu0 %1163, %v1606_v3  }
  0x6b   : > { %497 = vperm.xlu2 %1165, %v1606_v3   ;;  %487 = vperm.xlu1 %1164, %v1606_v3  }
  0x71   : > { %v371_v25 = vld.sshfl [vmem:[#allocation1 + $0x8] sm:$0xff pattern:$0x75316420]  ;;  %v370_v26 = vld.sshfl [vmem:[#allocation1] sm:$0xff pattern:$0x75316420] }
  0x72   : > { %374 = vrot.lane.b32.xlu0 %v370_v26, %s1420_s13  ;;  %385 = vst [vmem:[#allocation1] ss:$2 sm:$0xff] %v1611_v5 }
  0x73   : > { %360 = vrot.lane.b32.xlu2 %v355_v24, %s1421_s14  ;;  %358 = vrot.lane.b32.xlu1 %v354_v23, %s1421_s14 }
  0x74   : > { %1167 = vset.pattern.permute.xlu2 %v1422_v27  ;;  %1168 = vset.pattern.permute.xlu0 %v1423_v28  ;;  %v1444_v28 = vmov 31  }
  0x75   : > { %1166 = vset.pattern.permute.xlu1 %v1424_v29 }
  0x79   : > { %v387_v30 = vld.sshfl [vmem:[#allocation1 + $0x8] sm:$0xff pattern:$0x75316420]  ;;  %v386_v31 = vld.sshfl [vmem:[#allocation1] sm:$0xff pattern:$0x75316420] }
  0x7a   : > { %392 = vrot.lane.b32.xlu0 %v387_v30, %s1425_s20  ;;  %v317_v30 = vperm.slane %v1670_v59, 2 }
  0x7b   : > { %517 = vperm.xlu2 %1167, %v1606_v3   ;;  %376 = vrot.lane.b32.xlu1 %v371_v25, %s1420_s13 }
  0x82   : > { %527 = vperm.xlu0 %1168, %v1606_v3  }
  0x83   : > { %390 = vrot.lane.b32.xlu2 %v386_v31, %s1425_s20  ;;  %507 = vperm.xlu1 %1166, %v1606_v3   ;;  %v318_v31 = vperm.slane %v1672_v60, 2 }
  0x84   : > { %1170 = vset.pattern.permute.xlu2 %v1426_v32 }
  0x8a   : > { %1173 = vset.pattern.permute.xlu0 %v1427_v33  ;;  %v1445_v33 = vmov 30  }
  0x8b   : > { %551 = vperm.xlu2 %1170, %v1606_v3   ;;  %1169 = vset.pattern.permute.xlu1 %v1428_v34 }
  0x8c   : > { %581 = vperm.xlu0 %1173, %v1606_v3   ;;  %537 = vperm.xlu1 %1169, %v1606_v3  }
  0x92   : > { %v1640_v36 = vpop.permute.xlu2 %413 }
  0x93   : > { %1172 = vset.pattern.permute.xlu2 %v1429_v35 }
  0x94   : > { %1178 = vset.pattern.permute.xlu0 %v1430_v37  ;;  %571 = vperm.xlu2 %1172, %v1606_v3  }
  0x95   : > { %1171 = vset.pattern.permute.xlu1 %v1431_v38  ;;  %631 = vperm.xlu0 %1178, %v1606_v3  }
  0x96   : > { %561 = vperm.xlu1 %1171, %v1606_v3  }
  0x9b   : > { %v1645_v40 = vpop.permute.xlu2 %443 }
  0x9c   : > { %1175 = vset.pattern.permute.xlu2 %v1432_v39 }
  0x9d   : > { %1183 = vset.pattern.permute.xlu0 %v1433_v41  ;;  %601 = vperm.xlu2 %1175, %v1606_v3  }
  0x9e   : > { %1174 = vset.pattern.permute.xlu1 %v1434_v42  ;;  %685 = vperm.xlu0 %1183, %v1606_v3  }
  0x9f   : > { %591 = vperm.xlu1 %1174, %v1606_v3  }
  0xa5   : > { %1177 = vset.pattern.permute.xlu2 %v1435_v43  ;;  %v1650_v44 = vpop.permute.xlu2 %467 }
  0xa6   : > { %1188 = vset.pattern.permute.xlu0 %v1436_v45  ;;  %621 = vperm.xlu2 %1177, %v1606_v3  }
  0xa7   : > { %1176 = vset.pattern.permute.xlu1 %v1437_v46  ;;  %739 = vperm.xlu0 %1188, %v1606_v3  }
  0xa8   : > { %611 = vperm.xlu1 %1176, %v1606_v3  }
  0xab   : > { %v1655_v47 = vpop.permute.xlu1 %403 }
  0xad   : > { %v1657_v48 = vpop.permute.xlu2 %310 }
  0xae   : > { %1180 = vset.pattern.permute.xlu2 %v1438_v49 }
  0xaf   : > { %655 = vperm.xlu2 %1180, %v1606_v3   ;;  %1193 = vset.pattern.permute.xlu0 %v1405_v0  ;;  %v285_v0 = vperm.slane %v1670_v59, 0 }
  0xb0   : > { %1179 = vset.pattern.permute.xlu1 %v1439_v50  ;;  %797 = vperm.xlu0 %1193, %v1668_v58  }
  0xb1   : > { %645 = vperm.xlu1 %1179, %v1606_v3  }
  0xb4   : > { %v1662_v51 = vpop.permute.xlu1 %433  ;;  %v277_v52 = vpop.permute.xlu0 %276 }
  0xb5   : > { %v313_v53 = vpop.permute.xlu2 %312 }
  0xb6   : > { %v316_v32 = vsel %vm314_vm2, %v313_v53, %v1657_v48  ;;  %v315_v39 = vsel %vm314_vm2, %v1657_v48, %v313_v53  ;;  %v349_v48 = vperm.slane %v1670_v59, 5  ;;  %v1447_v53 = vmov 33  }
  0xb7   : > { %1182 = vset.pattern.permute.xlu2 %v1440_v55  ;;  %v1719_v46 = vmul.f32 %v317_v30, %v316_v32  ;;  %v334_v55 = vperm.slane %v1672_v60, 3 }
  0xb8   : > { %675 = vperm.xlu2 %1182, %v1606_v3   ;;  %1198 = vset.pattern.permute.xlu0 %v1411_v10 }
  0xb9   : > { %1181 = vset.pattern.permute.xlu1 %v1441_v56  ;;  %867 = vperm.xlu0 %1198, %v1668_v58   ;;  %v426_v50 = vperm.slane %v1719_v46, 0  ;;  %v446_v56 = vperm.slane %v1611_v5, 0 }
  0xba   : > { %665 = vperm.xlu1 %1181, %v1606_v3  }
  0xbc   : > { %v279_v61 = vpop.permute.xlu0 %278 }
  0xbd   : > { %v1674_v62 = vpop.permute.xlu2 %342  ;;  %v295_v63 = vpop.permute.xlu1 %294  ;;  %v283_v9 = vsel %vm282_vm0, %v277_v52, %v279_v61  ;;  %v284_v11 = vsel %vm282_vm0, %v279_v61, %v277_v52 }
  0xbe   : > { %v1683_v14 = vmul.f32 %v285_v0, %v284_v11  ;;  %v1685_v15 = vmul.f32 %v286_v4, %v283_v9 }
  0xc0   : > { %1185 = vset.pattern.permute.xlu2 %v1442_v8  ;;  %v406_v24 = vperm.slane %v1683_v14, 0  ;;  %v407_v25 = vperm.slane %v1685_v15, 0  ;;  %v501_v57 = vperm.slane %v1685_v15, 1 }
  0xc1   : > { %705 = vperm.xlu2 %1185, %v1606_v3   ;;  %1200 = vset.pattern.permute.xlu0 %v1417_v19 }
  0xc2   : > { %1184 = vset.pattern.permute.xlu1 %v1443_v12  ;;  %v408_v34 = vmul.f32 %v406_v24, %v1655_v47  ;;  %v409_v35 = vmul.f32 %v407_v25, %v1655_v47  ;;  %v1721_v47 = vmul.f32 %v318_v31, %v315_v39 }
  0xc3   : > { %695 = vperm.xlu1 %1184, %v1606_v3  }
  0xc4   : > { %v424_v18 = vpop.permute.xlu0 %423  ;;  %v427_v52 = vperm.slane %v1721_v47, 0 }
  0xc5   : > { %v1690_v20 = vpop.permute.xlu2 %497  ;;  %v297_v21 = vpop.permute.xlu1 %296  ;;  %v428_v8 = vmul.f32 %v426_v50, %v424_v18 }
  0xc6   : > { %v299_v22 = vsel %vm298_vm1, %v295_v63, %v297_v21  ;;  %v300_v23 = vsel %vm298_vm1, %v297_v21, %v295_v63  ;;  %v447_v63 = vperm.slane %v1611_v5, 4  ;;  %v429_v12 = vmul.f32 %v427_v52, %v424_v18 }
  0xc7   : > { %v1696_v26 = vmul.f32 %v301_v16, %v300_v23  ;;  %v1698_v27 = vmul.f32 %v302_v17, %v299_v22  ;;  %v450_v22 = vperm.slane %v446_v56, 0 }
  0xc8   : > { %v451_v23 = vperm.slane %v447_v63, 0 }
  0xc9   : > { %1187 = vset.pattern.permute.xlu2 %v1444_v28  ;;  %v416_v10 = vperm.slane %v1696_v26, 0  ;;  %v417_v29 = vperm.slane %v1698_v27, 0  ;;  %v452_v32 = vmul.f32 %v450_v22, %v1645_v40 }
  0xca   : > { %725 = vperm.xlu2 %1187, %v1606_v3  }
  0xcb   : > { %1186 = vset.pattern.permute.xlu1 %v1445_v33  ;;  %v418_v37 = vmul.f32 %v416_v10, %v1640_v36  ;;  %v419_v38 = vmul.f32 %v417_v29, %v1640_v36  ;;  %v1446_v36 = vmov 34   ;;  %v1448_v33 = vmov 35  }
  0xcc   : > { %715 = vperm.xlu1 %1186, %v1606_v3   ;;  %v327_v41 = vpop.permute.xlu0 %326 }
  0xcd   : > { %v420_v42 = vadd.f32 %v418_v37, %v408_v34  ;;  %v421_v43 = vadd.f32 %v419_v38, %v409_v35  ;;  %v1716_v45 = vpop.permute.xlu1 %457  ;;  %v1723_v49 = vpop.permute.xlu2 %360  ;;  %v453_v35 = vmul.f32 %v451_v23, %v1645_v40  ;;  %v350_v37 = vperm.slane %v1672_v60, 5 }
  0xcf   : > { %v430_v10 = vadd.f32 %v428_v8, %v420_v42  ;;  %v431_v18 = vadd.f32 %v429_v12, %v421_v43 }
  0xd2   : > { %1190 = vset.pattern.permute.xlu2 %v1446_v36 }
  0xd3   : > { %759 = vperm.xlu2 %1190, %v1606_v3  }
  0xd4   : > { %1189 = vset.pattern.permute.xlu1 %v1447_v53  ;;  %v345_v61 = vpop.permute.xlu0 %344 }
  0xd5   : > { %749 = vperm.xlu1 %1189, %v1606_v3   ;;  %v347_v0 = vsel %vm346_vm3, %v1674_v62, %v345_v61  ;;  %v329_v4 = vpop.permute.xlu1 %328  ;;  %v1745_v24 = vpop.permute.xlu2 %517 }
  0xd6   : > { %v331_v9 = vsel %vm330_vm4, %v327_v41, %v329_v4  ;;  %v332_v11 = vsel %vm330_vm4, %v329_v4, %v327_v41  ;;  %v1739_v16 = vmul.f32 %v349_v48, %v347_v0  ;;  %v365_v48 = vperm.slane %v1670_v59, 6  ;;  %v1202_v4 = vld [vmem:[#allocation8 + $0x18] ss:$0 sm:$0xff] }
  0xd7   : > { %v1741_v17 = vmul.f32 %v333_v54, %v332_v11  ;;  %v1743_v21 = vmul.f32 %v334_v55, %v331_v9  ;;  %v382_v11 = vperm.slane %v1672_v60, 7 }
  0xd8   : > { %v460_v29 = vperm.slane %v1739_v16, 0 }
  0xd9   : > { %v436_v25 = vperm.slane %v1741_v17, 0  ;;  %v437_v28 = vperm.slane %v1743_v21, 0 }
  0xda   : > { %v462_v41 = vmul.f32 %v460_v29, %v1716_v45 }
  0xdb   : > { %1192 = vset.pattern.permute.xlu2 %v1406_v1  ;;  %v438_v30 = vmul.f32 %v436_v25, %v1662_v51  ;;  %v439_v31 = vmul.f32 %v437_v28, %v1662_v51  ;;  %v348_v51 = vsel %vm346_vm3, %v345_v61, %v1674_v62 }
  0xdc   : > { %782 = vperm.xlu2 %1192, %v1668_v58   ;;  %v1755_v34 = vpop.permute.xlu0 %477  ;;  %v1766_v36 = vmul.f32 %v350_v37, %v348_v51  ;;  %v500_v37 = vperm.slane %v1683_v14, 1 }
  0xdd   : > { %1191 = vset.pattern.permute.xlu1 %v1448_v33  ;;  %v440_v1 = vadd.f32 %v438_v30, %v430_v10  ;;  %v441_v38 = vadd.f32 %v439_v31, %v431_v18  ;;  %v1760_v39 = vpop.permute.xlu1 %487  ;;  %v391_v40 = vpop.permute.xlu2 %390 }
  0xde   : > { %769 = vperm.xlu1 %1191, %v1606_v3   ;;  %v366_v3 = vperm.slane %v1672_v60, 6  ;;  %v461_v62 = vperm.slane %v1766_v36, 0 }
  0xdf   : > { %v454_v42 = vadd.f32 %v452_v32, %v440_v1  ;;  %v455_v43 = vadd.f32 %v453_v35, %v441_v38 }
  0xe1   : > { %v464_v50 = vadd.f32 %v462_v41, %v454_v42 }
  0xe4   : > { %1195 = vset.pattern.permute.xlu2 %v1409_v7  ;;  %v375_v52 = vpop.permute.xlu0 %374  ;;  %v463_v7 = vmul.f32 %v461_v62, %v1716_v45  ;;  %v510_v62 = vperm.slane %v1696_v26, 1 }
  0xe5   : > { %825 = vperm.xlu2 %1195, %v1668_v58   ;;  %v359_v53 = vpop.permute.xlu1 %358  ;;  %v1792_v22 = vpop.permute.xlu2 %551 }
  0xe6   : > { %1194 = vset.pattern.permute.xlu1 %v1407_v2  ;;  %v363_v54 = vsel %vm362_vm5, %v359_v53, %v1723_v49  ;;  %v364_v55 = vsel %vm362_vm5, %v1723_v49, %v359_v53  ;;  %v1201_v2 = vld [vmem:[#allocation8 + $0x10] ss:$0 sm:$0xff]  ;;  %v381_v49 = vperm.slane %v1670_v59, 7  ;;  %v465_v12 = vadd.f32 %v463_v7, %v455_v43 }
  0xe7   : > { %811 = vperm.xlu1 %1194, %v1668_v58   ;;  %v1778_v56 = vmul.f32 %v365_v48, %v363_v54  ;;  %v1780_v61 = vmul.f32 %v366_v3, %v364_v55  ;;  %v503_v48 = vmul.f32 %v501_v57, %v1690_v20  ;;  %v511_v53 = vperm.slane %v1698_v27, 1 }
  0xe8   : > { %v521_v54 = vperm.slane %v1721_v47, 1  ;;  %v541_v55 = vperm.slane %v1611_v5, 5 }
  0xe9   : > { %v470_v63 = vperm.slane %v1778_v56, 0  ;;  %v471_v0 = vperm.slane %v1780_v61, 0 }
  0xeb   : > { %v472_v8 = vmul.f32 %v470_v63, %v1650_v44  ;;  %v473_v9 = vmul.f32 %v471_v0, %v1650_v44 }
  0xec   : > { %v393_v45 = vpop.permute.xlu0 %392 }
  0xed   : > { %1197 = vset.pattern.permute.xlu2 %v1412_v13  ;;  %v395_v23 = vsel %vm394_vm6, %v391_v40, %v393_v45  ;;  %v396_v25 = vsel %vm394_vm6, %v393_v45, %v391_v40  ;;  %v377_v28 = vpop.permute.xlu1 %376  ;;  %v474_v10 = vadd.f32 %v472_v8, %v464_v50  ;;  %v475_v29 = vadd.f32 %v473_v9, %v465_v12 }
  0xee   : > { %853 = vperm.xlu2 %1197, %v1668_v58   ;;  %v1795_v59 = vmul.f32 %v1201_v2, %v395_v23  ;;  %v1797_v18 = vmul.f32 %v1202_v4, %v396_v25  ;;  %v379_v44 = vsel %vm378_vm7, %v375_v52, %v377_v28  ;;  %v380_v60 = vsel %vm378_vm7, %v377_v28, %v375_v52  ;;  %v572_v38 = vpop.permute.xlu2 %571 }
  0xef   : > { %1196 = vset.pattern.permute.xlu1 %v1408_v6  ;;  %v1804_v13 = vmul.f32 %v381_v49, %v379_v44  ;;  %v1806_v30 = vmul.f32 %v382_v11, %v380_v60  ;;  %v502_v40 = vmul.f32 %v500_v37, %v1690_v20  ;;  %v523_v4 = vmul.f32 %v521_v54, %v1745_v24 }
  0xf0   : > { %839 = vperm.xlu1 %1196, %v1668_v58   ;;  %v490_v31 = vperm.slane %v1795_v59, 0  ;;  %v491_v32 = vperm.slane %v1797_v18, 0  ;;  %v530_v9 = vperm.slane %v1741_v17, 1  ;;  %v531_v11 = vperm.slane %v1743_v21, 1 }
  0xf1   : > { %v480_v33 = vperm.slane %v1804_v13, 0  ;;  %v481_v35 = vperm.slane %v1806_v30, 0  ;;  %v545_v12 = vperm.slane %v541_v55, 1 }
  0xf2   : > { %v492_v42 = vmul.f32 %v490_v31, %v1760_v39  ;;  %v493_v43 = vmul.f32 %v491_v32, %v1760_v39  ;;  %v540_v39 = vperm.slane %v1611_v5, 1 }
  0xf3   : > { %v482_v6 = vmul.f32 %v480_v33, %v1755_v34  ;;  %v483_v1 = vmul.f32 %v481_v35, %v1755_v34  ;;  %v520_v34 = vperm.slane %v1719_v46, 1  ;;  %v555_v33 = vperm.slane %v1766_v36, 1 }
  0xf4   : > { %v528_v49 = vpop.permute.xlu0 %527 }
  0xf5   : > { %v484_v51 = vadd.f32 %v482_v6, %v474_v10  ;;  %v485_v41 = vadd.f32 %v483_v1, %v475_v29  ;;  %v508_v50 = vpop.permute.xlu1 %507  ;;  %v522_v2 = vmul.f32 %v520_v34, %v1745_v24  ;;  %v532_v25 = vmul.f32 %v530_v9, %v528_v49 }
  0xf6   : > { %v512_v63 = vmul.f32 %v510_v62, %v508_v50  ;;  %v513_v0 = vmul.f32 %v511_v53, %v508_v50  ;;  %v533_v28 = vmul.f32 %v531_v11, %v528_v49  ;;  %v554_v24 = vperm.slane %v1739_v16, 1 }
  0xf7   : > { %v494_v3 = vadd.f32 %v492_v42, %v484_v51  ;;  %v495_v52 = vadd.f32 %v493_v43, %v485_v41  ;;  %v602_v29 = vpop.permute.xlu2 %601  ;;  %v557_v6 = vmul.f32 %v555_v33, %v1792_v22  ;;  %v564_v1 = vperm.slane %v1778_v56, 1 }
  0xf8   : > { %1199 = vset.pattern.permute.xlu1 %v1417_v19  ;;  %v556_v57 = vmul.f32 %v554_v24, %v1792_v22  ;;  %v565_v51 = vperm.slane %v1780_v61, 1  ;;  %v574_v41 = vperm.slane %v1804_v13, 1  ;;  %v575_v42 = vperm.slane %v1806_v30, 1 }
  0xf9   : > { %881 = vperm.xlu1 %1199, %v1668_v58   ;;  %v504_v7 = vadd.f32 %v502_v40, %v494_v3  ;;  %v505_v20 = vadd.f32 %v503_v48, %v495_v52  ;;  %v544_v58 = vperm.slane %v540_v39, 1  ;;  %v584_v22 = vperm.slane %v1795_v59, 1 }
  0xfa   : > { %v576_v34 = vmul.f32 %v574_v41, %v572_v38  ;;  %v577_v54 = vmul.f32 %v575_v42, %v572_v38  ;;  %v585_v39 = vperm.slane %v1797_v18, 1  ;;  %v604_v49 = vperm.slane %v1696_v26, 2 }
  0xfb   : > { %v514_v19 = vadd.f32 %v512_v63, %v504_v7  ;;  %v515_v8 = vadd.f32 %v513_v0, %v505_v20  ;;  %v634_v24 = vperm.slane %v1611_v5, 2  ;;  %v635_v33 = vperm.slane %v1611_v5, 6 }
  0xfd   : > { %v524_v45 = vadd.f32 %v522_v2, %v514_v19  ;;  %v525_v23 = vadd.f32 %v523_v4, %v515_v8  ;;  %v594_v2 = vperm.slane %v1683_v14, 2  ;;  %v595_v4 = vperm.slane %v1685_v15, 2 }
  0xfe   : > { %v538_v10 = vpop.permute.xlu1 %537  ;;  %v582_v55 = vpop.permute.xlu0 %581  ;;  %v605_v19 = vperm.slane %v1698_v27, 2 }
  0xff   : > { %v534_v44 = vadd.f32 %v532_v25, %v524_v45  ;;  %v535_v60 = vadd.f32 %v533_v28, %v525_v23  ;;  %v546_v31 = vmul.f32 %v544_v58, %v538_v10  ;;  %v547_v32 = vmul.f32 %v545_v12, %v538_v10 }
 0x100   : > { %v622_v52 = vpop.permute.xlu2 %621  ;;  %v586_v63 = vmul.f32 %v584_v22, %v582_v55  ;;  %v587_v0 = vmul.f32 %v585_v39, %v582_v55  ;;  %v606_v12 = vmul.f32 %v604_v49, %v602_v29  ;;  %v607_v45 = vmul.f32 %v605_v19, %v602_v29 }
 0x101   : > { %v548_v35 = vadd.f32 %v546_v31, %v534_v44  ;;  %v549_v37 = vadd.f32 %v547_v32, %v535_v60  ;;  %v614_v60 = vperm.slane %v1719_v46, 2  ;;  %v615_v31 = vperm.slane %v1721_v47, 2 }
 0x102   : > { %v625_v29 = vperm.slane %v1743_v21, 2 }
 0x103   : > { %v558_v50 = vadd.f32 %v556_v57, %v548_v35  ;;  %v559_v40 = vadd.f32 %v557_v6, %v549_v37  ;;  %v624_v57 = vperm.slane %v1741_v17, 2 }
 0x108   : > { %v562_v43 = vpop.permute.xlu1 %561 }
 0x109   : > { %v566_v48 = vmul.f32 %v564_v1, %v562_v43  ;;  %v567_v3 = vmul.f32 %v565_v51, %v562_v43  ;;  %v656_v23 = vpop.permute.xlu2 %655  ;;  %v638_v1 = vperm.slane %v634_v24, 2  ;;  %v639_v51 = vperm.slane %v635_v33, 2 }
 0x10a   : > { %v626_v43 = vmul.f32 %v624_v57, %v622_v52  ;;  %v689_v33 = vperm.slane %v1685_v15, 3 }
 0x10b   : > { %v568_v62 = vadd.f32 %v566_v48, %v558_v50  ;;  %v569_v53 = vadd.f32 %v567_v3, %v559_v40  ;;  %v627_v50 = vmul.f32 %v625_v29, %v622_v52  ;;  %v632_v40 = vpop.permute.xlu0 %631  ;;  %v648_v48 = vperm.slane %v1739_v16, 2 }
 0x10c   : > { %v649_v3 = vperm.slane %v1766_v36, 2 }
 0x10d   : > { %v578_v7 = vadd.f32 %v576_v34, %v568_v62  ;;  %v579_v20 = vadd.f32 %v577_v54, %v569_v53  ;;  %v640_v62 = vmul.f32 %v638_v1, %v632_v40  ;;  %v641_v53 = vmul.f32 %v639_v51, %v632_v40 }
 0x10e   : > { %v698_v1 = vperm.slane %v1696_v26, 3  ;;  %v699_v51 = vperm.slane %v1698_v27, 3  ;;  %v718_v26 = vperm.slane %v1741_v17, 3  ;;  %v719_v27 = vperm.slane %v1743_v21, 3 }
 0x10f   : > { %v588_v9 = vadd.f32 %v586_v63, %v578_v7  ;;  %v589_v38 = vadd.f32 %v587_v0, %v579_v20  ;;  %v658_v0 = vperm.slane %v1778_v56, 2  ;;  %v743_v17 = vperm.slane %v1766_v36, 3 }
 0x111   : > { %v592_v8 = vpop.permute.xlu1 %591  ;;  %v660_v49 = vmul.f32 %v658_v0, %v656_v23 }
 0x112   : > { %v596_v11 = vmul.f32 %v594_v2, %v592_v8  ;;  %v597_v58 = vmul.f32 %v595_v4, %v592_v8  ;;  %v676_v6 = vpop.permute.xlu2 %675  ;;  %v659_v2 = vperm.slane %v1780_v61, 2  ;;  %v668_v8 = vperm.slane %v1804_v13, 2 }
 0x113   : > { %v686_v24 = vpop.permute.xlu0 %685 }
 0x114   : > { %v598_v25 = vadd.f32 %v596_v11, %v588_v9  ;;  %v599_v28 = vadd.f32 %v597_v58, %v589_v38  ;;  %v661_v19 = vmul.f32 %v659_v2, %v656_v23  ;;  %v669_v9 = vperm.slane %v1806_v30, 2 }
 0x115   : > { %v688_v23 = vperm.slane %v1683_v14, 3  ;;  %v691_v29 = vmul.f32 %v689_v33, %v686_v24  ;;  %v729_v14 = vperm.slane %v1611_v5, 7 }
 0x116   : > { %v608_v10 = vadd.f32 %v606_v12, %v598_v25  ;;  %v609_v44 = vadd.f32 %v607_v45, %v599_v28  ;;  %v678_v25 = vperm.slane %v1795_v59, 2  ;;  %v679_v28 = vperm.slane %v1797_v18, 2 }
 0x117   : > { %v690_v57 = vmul.f32 %v688_v23, %v686_v24 }
 0x11a   : > { %v612_v32 = vpop.permute.xlu1 %611 }
 0x11b   : > { %v616_v35 = vmul.f32 %v614_v60, %v612_v32  ;;  %v617_v37 = vmul.f32 %v615_v31, %v612_v32  ;;  %v706_v63 = vpop.permute.xlu2 %705  ;;  %v680_v60 = vmul.f32 %v678_v25, %v676_v6  ;;  %v681_v31 = vmul.f32 %v679_v28, %v676_v6 }
 0x11d   : > { %v618_v41 = vadd.f32 %v616_v35, %v608_v10  ;;  %v619_v42 = vadd.f32 %v617_v37, %v609_v44 }
 0x11f   : > { %v628_v34 = vadd.f32 %v626_v43, %v618_v41  ;;  %v629_v54 = vadd.f32 %v627_v50, %v619_v42 }
 0x121   : > { %v642_v7 = vadd.f32 %v640_v62, %v628_v34  ;;  %v643_v20 = vadd.f32 %v641_v53, %v629_v54  ;;  %v708_v62 = vperm.slane %v1719_v46, 3  ;;  %v709_v53 = vperm.slane %v1721_v47, 3 }
 0x122   : > { %v733_v54 = vperm.slane %v729_v14, 3  ;;  %v742_v47 = vperm.slane %v1739_v16, 3  ;;  %v763_v16 = vperm.slane %v1806_v30, 3 }
 0x123   : > { %v646_v22 = vpop.permute.xlu1 %645 }
 0x124   : > { %v650_v39 = vmul.f32 %v648_v48, %v646_v22  ;;  %v651_v55 = vmul.f32 %v649_v3, %v646_v22  ;;  %v726_v32 = vpop.permute.xlu2 %725  ;;  %v728_v3 = vperm.slane %v1611_v5, 3 }
 0x126   : > { %v652_v52 = vadd.f32 %v650_v39, %v642_v7  ;;  %v653_v4 = vadd.f32 %v651_v55, %v643_v20  ;;  %v732_v34 = vperm.slane %v728_v3, 3  ;;  %v710_v39 = vmul.f32 %v708_v62, %v706_v63 }
 0x127   : > { %v711_v55 = vmul.f32 %v709_v53, %v706_v63  ;;  %v753_v63 = vperm.slane %v1780_v61, 3  ;;  %v773_v61 = vperm.slane %v1797_v18, 3 }
 0x128   : > { %v662_v11 = vadd.f32 %v660_v49, %v652_v52  ;;  %v663_v58 = vadd.f32 %v661_v19, %v653_v4  ;;  %v734_v5 = vmul.f32 %v732_v34, %v726_v32  ;;  %v735_v4 = vmul.f32 %v733_v54, %v726_v32  ;;  %v740_v19 = vpop.permute.xlu0 %739 }
 0x12c   : > { %v666_v38 = vpop.permute.xlu1 %665 }
 0x12d   : > { %v670_v12 = vmul.f32 %v668_v8, %v666_v38  ;;  %v671_v45 = vmul.f32 %v669_v9, %v666_v38  ;;  %v760_v15 = vpop.permute.xlu2 %759  ;;  %v752_v9 = vperm.slane %v1778_v56, 3  ;;  %v772_v56 = vperm.slane %v1795_v59, 3 }
 0x12e   : > { %v765_v24 = vmul.f32 %v763_v16, %v760_v15 }
 0x12f   : > { %v672_v10 = vadd.f32 %v670_v12, %v662_v11  ;;  %v673_v44 = vadd.f32 %v671_v45, %v663_v58  ;;  %v744_v11 = vmul.f32 %v742_v47, %v740_v19  ;;  %v745_v58 = vmul.f32 %v743_v17, %v740_v19  ;;  %v1203_v17 = vld [vmem:[%s1589_s10] sm:$0xff]  ;;  %s911_s10 = sshll.u32 %s907_s5, 4  ;;  %s912_s10 = int_to_ptr.hbm [resolvable:$true] %s911_s10 }
 0x130   : > { %s1338_s21 = sshra.s32 %s912_s10, 4  ;;  %s1339_s21 = int_to_ptr.hbm [resolvable:$true] %s1338_s21 }
 0x131   : > { %v682_v35 = vadd.f32 %v680_v60, %v672_v10  ;;  %v683_v37 = vadd.f32 %v681_v31, %v673_v44  ;;  %v798_v10 = vpop.permute.xlu0 %797  ;;  %v762_v60 = vperm.slane %v1804_v13, 3  ;;  %s1340_s26 = scalar_lea.hbm %s1339_s21, 8  ;;  %p1345_p9 = scmp.lt.s32.totalorder %s1339_s21, %s1937_s4 }
 0x132   : > { %p1341_p1 = scmp.ne.s32.totalorder %s1339_s21, %s1340_s26  ;;  %p1346_p10 = scmp.lt.s32.totalorder %s1344_s7, %s1340_s26 }
 0x133   : > { %v692_v42 = vadd.f32 %v690_v57, %v682_v35  ;;  %v693_v43 = vadd.f32 %v691_v29, %v683_v37  ;;  %v764_v32 = vmul.f32 %v762_v60, %v760_v15 }
 0x134   : > { %p1342_p4 = pnand %p1341_p1, %p1556_p3  ;;  %p1347_p2 = por %p1346_p10, %p1345_p9 }
 0x135   : > { %v696_v41 = vpop.permute.xlu1 %695 }
 0x136   : > { %v700_v50 = vmul.f32 %v698_v1, %v696_v41  ;;  %v701_v40 = vmul.f32 %v699_v51, %v696_v41  ;;  %v783_v52 = vpop.permute.xlu2 %782  ;;  %p1343_p8 = pneg %p1342_p4 }
 0x138   : > { %v702_v6 = vadd.f32 %v700_v50, %v692_v42  ;;  %v703_v48 = vadd.f32 %v701_v40, %v693_v43  ;;  %p1348_p11 = pnand %p1347_p2, %p1343_p8 }
 0x139   : > { %v868_v30 = vpop.permute.xlu0 %867 }
 0x13a   : > { %v712_v0 = vadd.f32 %v710_v39, %v702_v6  ;;  %v713_v2 = vadd.f32 %v711_v55, %v703_v48 }
 0x13e   : > { %v716_v22 = vpop.permute.xlu1 %715 }
 0x13f   : > { %v720_v7 = vmul.f32 %v718_v26, %v716_v22  ;;  %v721_v20 = vmul.f32 %v719_v27, %v716_v22  ;;  %v826_v44 = vpop.permute.xlu2 %825 }
 0x141   : > { %v722_v49 = vadd.f32 %v720_v7, %v712_v0  ;;  %v723_v46 = vadd.f32 %v721_v20, %v713_v2 }
 0x143   : > { %v736_v21 = vadd.f32 %v734_v5, %v722_v49  ;;  %v737_v8 = vadd.f32 %v735_v4, %v723_v46 }
 0x145   : > { %v746_v25 = vadd.f32 %v744_v11, %v736_v21  ;;  %v747_v28 = vadd.f32 %v745_v58, %v737_v8 }
 0x147   : > { %v750_v38 = vpop.permute.xlu1 %749 }
 0x148   : > { %v754_v12 = vmul.f32 %v752_v9, %v750_v38  ;;  %v755_v45 = vmul.f32 %v753_v63, %v750_v38  ;;  %v854_v41 = vpop.permute.xlu2 %853 }
 0x14a   : > { %v756_v36 = vadd.f32 %v754_v12, %v746_v25  ;;  %v757_v31 = vadd.f32 %v755_v45, %v747_v28 }
 0x14c   : > { %v766_v33 = vadd.f32 %v764_v32, %v756_v36  ;;  %v767_v35 = vadd.f32 %v765_v24, %v757_v31 }
 0x150   : > { %v770_v23 = vpop.permute.xlu1 %769 }
 0x151   : > { %v774_v37 = vmul.f32 %v772_v56, %v770_v23  ;;  %v775_v57 = vmul.f32 %v773_v61, %v770_v23 }
 0x153   : > { %v776_v29 = vadd.f32 %v774_v37, %v766_v33  ;;  %v777_v1 = vadd.f32 %v775_v57, %v767_v35 }
 0x155   : > { %v1879_v51 = vmax.f32 %v776_v29, 0.0  ;;  %v779_v13 = vmax.f32 %v777_v1, 0.0 }
 0x157   : > { %v870_v42 = vperm.slane %v1879_v51, 6  ;;  %v871_v43 = vperm.slane %v779_v13, 6  ;;  %v856_v59 = vperm.slane %v1879_v51, 5  ;;  %v857_v50 = vperm.slane %v779_v13, 5 }
 0x158   : > { %v785_v18 = vperm.slane %v1879_v51, 0  ;;  %v786_v40 = vperm.slane %v779_v13, 0  ;;  %v800_v6 = vperm.slane %v1879_v51, 1  ;;  %v801_v48 = vperm.slane %v779_v13, 1 }
 0x159   : > { %v872_v3 = vmul.f32 %v870_v42, %v868_v30  ;;  %v873_v14 = vmul.f32 %v871_v43, %v868_v30  ;;  %v858_v15 = vmul.f32 %v856_v59, %v854_v41  ;;  %v859_v62 = vmul.f32 %v857_v50, %v854_v41  ;;  %v812_v53 = vpop.permute.xlu1 %811 }
 0x15a   : > { %v787_v26 = vmul.f32 %v785_v18, %v783_v52  ;;  %v788_v27 = vmul.f32 %v786_v40, %v783_v52  ;;  %v802_v34 = vmul.f32 %v800_v6, %v798_v10  ;;  %v803_v54 = vmul.f32 %v801_v48, %v798_v10 }
 0x15b   : > { %v876_v22 = vrot.slane %v873_v14, 4  ;;  %v862_v39 = vrot.slane %v859_v62, 4  ;;  %v814_v55 = vperm.slane %v1879_v51, 2  ;;  %v815_v7 = vperm.slane %v779_v13, 2 }
 0x15c   : > { %v791_v20 = vrot.slane %v788_v27, 4  ;;  %v806_v0 = vrot.slane %v803_v54, 4  ;;  %v828_v2 = vperm.slane %v1879_v51, 3  ;;  %v829_v5 = vperm.slane %v779_v13, 3 }
 0x15d   : > { %v877_v4 = vsel %vm792_vm8, %v872_v3, %v876_v22  ;;  %v863_v49 = vsel %vm792_vm8, %v858_v15, %v862_v39  ;;  %v817_v46 = vmul.f32 %v815_v7, %v812_v53  ;;  %v816_v8 = vmul.f32 %v814_v55, %v812_v53 }
 0x15e   : > { %v793_v52 = vsel %vm792_vm8, %v787_v26, %v791_v20  ;;  %v807_v19 = vsel %vm792_vm8, %v802_v34, %v806_v0  ;;  %v831_v47 = vmul.f32 %v829_v5, %v826_v44  ;;  %v830_v63 = vmul.f32 %v828_v2, %v826_v44 }
 0x15f   : > { %v795_v21 = vadd.f32 %v1203_v17, %v793_v52  ;;  %v820_v9 = vrot.slane %v817_v46, 4  ;;  %v843_v12 = vperm.slane %v779_v13, 4  ;;  %v842_v10 = vperm.slane %v1879_v51, 4 }
 0x160   : > { %v834_v38 = vrot.slane %v831_v47, 4  ;;  %v885_v56 = vperm.slane %v779_v13, 7  ;;  %v884_v33 = vperm.slane %v1879_v51, 7 }
 0x161   : > { %v809_v11 = vadd.f32 %v807_v19, %v795_v21  ;;  %v821_v58 = vsel %vm792_vm8, %v816_v8, %v820_v9 }
 0x162   : > { %v835_v45 = vsel %vm792_vm8, %v830_v63, %v834_v38  ;;  %v840_v25 = vpop.permute.xlu1 %839 }
 0x163   : > { %v823_v28 = vadd.f32 %v821_v58, %v809_v11  ;;  %v845_v60 = vmul.f32 %v843_v12, %v840_v25  ;;  %v844_v36 = vmul.f32 %v842_v10, %v840_v25 }
 0x165   : > { %v837_v16 = vadd.f32 %v835_v45, %v823_v28  ;;  %v848_v31 = vrot.slane %v845_v60, 4 }
 0x167   : > { %v849_v32 = vsel %vm792_vm8, %v844_v36, %v848_v31 }
 0x168   : > { %v851_v24 = vadd.f32 %v849_v32, %v837_v16 }
 0x16a   : > { %v865_v44 = vadd.f32 %v863_v49, %v851_v24 }
 0x16b   : > { %v882_v61 = vpop.permute.xlu1 %881 }
 0x16c   : > { %v879_v23 = vadd.f32 %v877_v4, %v865_v44  ;;  %v887_v35 = vmul.f32 %v885_v56, %v882_v61  ;;  %v886_v37 = vmul.f32 %v884_v33, %v882_v61 }
 0x16e   : > { %v890_v57 = vrot.slane %v887_v35, 4 }
 0x170   : > { %v891_v29 = vsel %vm792_vm8, %v886_v37, %v890_v57 }
 0x171   : > { %v893_v1 = vadd.f32 %v891_v29, %v879_v23 }
 0x173   : > { %894 = vst [vmem:[%s261_s6] sm:$0xff] %v893_v1 }
 0x174   : > { %1351 = shalt.err (!%p1348_p11)
}
 0x175   : > { %1047 = dma.vmem_to_hbm [thread:$0]  (%p1556_p3), %s910_s8, 128, %s912_s10, %s896_s19  }
 0x176 PF: > { %s923_s29 = sand.u32 1, %s1386_s15   ;;  %p1944_p12 = scmp.ge.s32.totalorder %s1398_s18, 2 }
 0x177   : > { %s924_s14 = scalar_lea.sflag [#allocation4], %s923_s29 }
 0x178   : > { %p1064_p13 = pnand %p1944_p12, %p1509_p6 }
 0x17a   : > { %p1065_p0 = pneg %p1064_p13 }
 0x17c   : > { %1381 = dma.done.wait (%p1065_p0), %s924_s14, 128  }
 0x17d   : > { %1383 = vsyncadd (%p1065_p0), %s924_s14, 4294967168  ;;  %p19_p5 = scmp.ge.s32.totalorder %s1543_s23, 4   ;;  %s1945_s15 = smov %s1390_s16 }
 0x17e   : > { %s1946_s16 = smov %s1394_s17  ;;  %s1947_s17 = smov %s1552_s27 }
 0x17f   : > { %s1948_s18 = smov %s1543_s23  ;;  %21 = sbr.rel (!%p19_p5) target bundleno = 7 (0x7), region = 93 }
 0x184   :  { %930 = vsyncpa [#allocation3], 1 }
 0x185   :  { %932 = vsyncpa [#allocation3 + $0x1], 1 }
 0x186   :  { %933 = vsyncpa [#allocation6], 1 }
 0x187   :  { %934 = vsyncpa [#allocation9], 1 }
 0x188   :  { %935 = vsyncpa [#allocation4], 1 }
 0x189   :  { %937 = vsyncpa [#allocation4 + $0x1], 1 }

</bundles_post_ra>
